<compile_context>
chip_gen: v7x
topology: tpu7x:2x2x1
jax: 0.10.0
libtpu: 0.0.40
codegen_flags: <defaults>
</compile_context>

<pallas_src>
import jax
import jax.numpy as jnp
import numpy as np
from jax import lax
from jax.experimental import pallas as pl
from jax.experimental.pallas import tpu as pltpu

LANE = 128


def _round_up(x, m):
    return (x + m - 1) // m * m


def _pad2(a, rows, cols):
    return jnp.pad(a, ((0, rows - a.shape[0]), (0, cols - a.shape[1])))


def _pick_tile(n_pad, prefer):
    for t in (prefer, 512, 256, 128):
        if t <= n_pad and n_pad % t == 0:
            return t
    return n_pad


def _node_vmem_limit(n_pad, f_pad, h_pad, tk):
    """Right-sized scoped-VMEM budget for the fused node kernel (x2 headroom)."""
    f32, bf16 = 4, 2
    b = 0
    b += 2 * n_pad * tk * bf16                       # A_hat column panel (dbl-buffered)
    b += 2 * tk * f_pad * f32                        # X source block
    b += 2 * n_pad * LANE * f32                      # dinv (n_pad,1) lane-padded
    b += 2 * (f_pad * h_pad + 2 * h_pad * h_pad) * f32  # W1, W2, Wout (resident)
    b += 2 * (5 * h_pad + LANE) * f32                # biases + we_i/we_j + be (approx)
    b += 2 * n_pad * n_pad * f32                     # fused logits output block
    b += (2 * n_pad * h_pad + tk * h_pad) * f32      # scratch: acc, h1, z
    return int(min(100 * 2**20, max(4 * 2**20, 2 * b)))


# --------------------------------------------------------------------------
# Fused node + edge kernel.
# grid = (layer, k_block): layer is the sequential GCN layer (0/1), k_block is
# the reduction over source nodes of the A_hat @ Z contraction.  The final
# grid step runs out_proj + both edge projections and emits the full
# lane-dense (n_pad, n_pad) logits block.
# --------------------------------------------------------------------------
def node_kernel(a_ref, dinv_ref, x_ref,
                w1_ref, b1_ref, w2_ref, b2_ref,
                wout_ref, bout_ref, wei_ref, wej_ref, be_ref,
                logits_ref,
                acc_ref, h1_ref, z_ref):
    l = pl.program_id(0)               # GCN layer index (outer, sequential)
    k = pl.program_id(1)               # source-node reduction block
    nk = pl.num_programs(1)
    tk = a_ref.shape[1]

    @pl.when(k == 0)
    def _():
        acc_ref[...] = jnp.zeros_like(acc_ref)

    start = pl.multiple_of(k * tk, tk)
    dk = dinv_ref[pl.ds(start, tk), :]                     # (tk, 1) f32

    # Per-layer feature transform for this source block (small matmul, f32).
    @pl.when(l == 0)
    def _():
        z_ref[...] = jnp.dot(x_ref[...], w1_ref[...],
                             preferred_element_type=jnp.float32)

    @pl.when(l == 1)
    def _():
        z_ref[...] = jnp.dot(h1_ref[pl.ds(start, tk), :], w2_ref[...],
                             preferred_element_type=jnp.float32)

    # Fused GCN normalization: A_norm @ Z == dinv_i * (A_hat @ (dinv_k * Z)).
    # A_hat entries are 0/1 so bf16 storage is lossless; accumulate in f32.
    zb = (z_ref[...] * dk).astype(a_ref.dtype)
    acc_ref[...] += jnp.dot(a_ref[...], zb, preferred_element_type=jnp.float32)

    @pl.when((l == 0) & (k == nk - 1))
    def _():
        h1_ref[...] = jnp.maximum(dinv_ref[...] * acc_ref[...] + b1_ref[...], 0.0)

    @pl.when((l == 1) & (k == nk - 1))
    def _():
        h2 = jnp.maximum(dinv_ref[...] * acc_ref[...] + b2_ref[...], 0.0)
        y = jnp.dot(h2, wout_ref[...],
                    preferred_element_type=jnp.float32) + bout_ref[...]
        # logits[i, j] = y[i] @ we_i + y[j] @ we_j + be  ->  col[i] + row[j]
        col = jnp.dot(y, wei_ref[...],
                      preferred_element_type=jnp.float32) + be_ref[...]   # (n_pad, 1)
        # (1, n_pad) row of y @ we_j without materializing a transpose.
        row = lax.dot_general(wej_ref[...], y,
                              dimension_numbers=(((1,), (1,)), ((), ())),
                              preferred_element_type=jnp.float32)         # (1, n_pad)
        # Lane-dense (n_pad, n_pad) store: the only output write of the kernel.
        logits_ref[...] = col + row


def saggnn_forward(x, edge_index, params, *, mxu_dtype=jnp.bfloat16, node_tk=512):
    n, f = x.shape
    hidden = params["w1"].shape[1]

    n_pad = _round_up(max(n, 8), LANE)
    f_pad = _round_up(f, LANE)
    h_pad = _round_up(hidden, LANE)

    # Fused edge-logit path keeps the whole (n_pad, n_pad) block VMEM-resident.
    assert n_pad <= 2048, "fused edge-logit path is sized for small/medium graphs"

    # Dense self-looped adjacency (normalization happens inside the kernel).
    # NOTE: .at[dst, src].set(1.0) deduplicates repeated edges.
    src, dst = edge_index[0], edge_index[1]
    a_hat = jnp.zeros((n_pad, n_pad), jnp.float32).at[dst, src].set(1.0)
    a_hat = a_hat.at[jnp.arange(n), jnp.arange(n)].set(1.0)     # self loops (real nodes only)
    deg = jnp.sum(a_hat, axis=1)
    dinv = jnp.where(deg > 0, lax.rsqrt(jnp.maximum(deg, 1.0)), 0.0)
    dinv = dinv[:, None].astype(jnp.float32)                    # (n_pad, 1); 0 on padded rows
    a_hat = a_hat.astype(mxu_dtype)                             # 0/1 -> lossless in bf16

    # Zero-padded, lane-dense parameter packing (padding does not perturb the
    # real output region: padded rows/cols of A, W are zero and dinv is zero
    # for padded sources; the [:n,:n] slice drops padded destinations).
    x_p = _pad2(x.astype(jnp.float32), n_pad, f_pad)
    w1 = _pad2(params["w1"], f_pad, h_pad); b1 = _pad2(params["b1"], 1, h_pad)
    w2 = _pad2(params["w2"], h_pad, h_pad); b2 = _pad2(params["b2"], 1, h_pad)
    wout = _pad2(params["wout"], h_pad, h_pad); bout = _pad2(params["bout"], 1, h_pad)
    wei = _pad2(params["we_i"], h_pad, 1)
    wej = _pad2(params["we_j"], 1, h_pad)
    be = params["be"].reshape(1, 1).astype(jnp.float32)

    tk = _pick_tile(n_pad, node_tk)
    nk = n_pad // tk

    def resident(shape):
        return pl.BlockSpec(shape, lambda l, k: (0,) * len(shape))

    node_in_specs = [
        pl.BlockSpec((n_pad, tk), lambda l, k: (0, k)),    # A_hat column panel (streamed)
        resident((n_pad, 1)),                              # dinv
        # X source block: streamed during layer 0, pinned to (0,0) during layer 1
        # (it is never read there) so it is not re-fetched from HBM.
        pl.BlockSpec((tk, f_pad), lambda l, k: (k * (1 - l), 0)),
        resident((f_pad, h_pad)), resident((1, h_pad)),    # W1, b1
        resident((h_pad, h_pad)), resident((1, h_pad)),    # W2, b2
        resident((h_pad, h_pad)), resident((1, h_pad)),    # Wout, bout
        resident((h_pad, 1)), resident((1, h_pad)),        # we_i, we_j
        resident((1, 1)),                                  # be
    ]
    # Single lane-dense logits output block, written once on the final grid step.
    node_out_specs = pl.BlockSpec((n_pad, n_pad), lambda l, k: (0, 0))

    a_reads = 2 if nk > 1 else 1   # with nk==1 the A block index never changes
    node_cost = pl.CostEstimate(
        flops=(2 * 2 * n_pad * n_pad * h_pad               # A_hat @ Z, both layers
               + 2 * n_pad * f_pad * h_pad                 # X @ W1
               + 2 * 2 * n_pad * h_pad * h_pad             # H1 @ W2, H2 @ Wout
               + 4 * n_pad * h_pad                         # edge projections
               + n_pad * n_pad),                           # fused col + row broadcast add
        transcendentals=0,
        bytes_accessed=(a_reads * a_hat.size * a_hat.dtype.itemsize
                        + x_p.size * 4
                        + (f_pad * h_pad + 2 * h_pad * h_pad) * 4
                        + n_pad * n_pad * 4))

    logits = pl.pallas_call(
        node_kernel,
        out_shape=jax.ShapeDtypeStruct((n_pad, n_pad), jnp.float32),
        grid=(2, nk),
        in_specs=node_in_specs,
        out_specs=node_out_specs,
        scratch_shapes=[pltpu.VMEM((n_pad, h_pad), jnp.float32),   # A@Z accumulator
                        pltpu.VMEM((n_pad, h_pad), jnp.float32),   # layer-1 activations
                        pltpu.VMEM((tk, h_pad), jnp.float32)],     # per-block Z
        compiler_params=pltpu.CompilerParams(
            dimension_semantics=("arbitrary", "arbitrary"),
            vmem_limit_bytes=_node_vmem_limit(n_pad, f_pad, h_pad, tk)),
        cost_estimate=node_cost,
    )(a_hat, dinv, x_p, w1, b1, w2, b2, wout, bout, wei, wej, be)

    return logits[:n, :n]


def saggnn_reference(x, edge_index, params, mxu_dtype=jnp.bfloat16):
    """Pure-JAX reference mirroring the kernel numerics (bf16 MXU operands,
    f32 accumulation) of PyTorch GCNConv->GCNConv->out_proj->edge_proj."""
    n = x.shape[0]
    src, dst = edge_index[0], edge_index[1]
    a_hat = jnp.zeros((n, n), jnp.float32).at[dst, src].set(1.0)
    a_hat = a_hat.at[jnp.arange(n), jnp.arange(n)].set(1.0)
    deg = jnp.sum(a_hat, axis=1)
    dinv = jnp.where(deg > 0, lax.rsqrt(jnp.maximum(deg, 1.0)), 0.0)[:, None]
    a_mx = a_hat.astype(mxu_dtype)

    def gcn(h, w, b):
        z = (jnp.dot(h, w) * dinv).astype(mxu_dtype)
        agg = jnp.dot(a_mx, z, preferred_element_type=jnp.float32)
        return jnp.maximum(dinv * agg + b, 0.0)

    h = gcn(x, params["w1"], params["b1"])
    h = gcn(h, params["w2"], params["b2"])
    y = jnp.dot(h, params["wout"]) + params["bout"]
    col = jnp.dot(y, params["we_i"]) + params["be"]          # (n, 1)
    row = jnp.dot(y, params["we_j"].T).T                     # (1, n)
    return col + row


def init_params(key, in_dim, hidden):
    ks = jax.random.split(key, 6)
    scale = 0.1
    return {
        # GCNConv weights stored as (in, out) so the kernel computes X @ W.
        "w1": scale * jax.random.normal(ks[0], (in_dim, hidden), jnp.float32),
        "b1": jnp.zeros((1, hidden), jnp.float32),
        "w2": scale * jax.random.normal(ks[1], (hidden, hidden), jnp.float32),
        "b2": jnp.zeros((1, hidden), jnp.float32),
        # out_proj: Linear(hidden, hidden)
        "wout": scale * jax.random.normal(ks[2], (hidden, hidden), jnp.float32),
        "bout": scale * jax.random.normal(ks[3], (1, hidden), jnp.float32),
        # edge_proj: Linear(2*hidden, 1) split into the x_i half and the x_j half.
        "we_i": scale * jax.random.normal(ks[4], (hidden, 1), jnp.float32),
        "we_j": scale * jax.random.normal(ks[5], (1, hidden), jnp.float32),
        "be": jnp.full((1, 1), 0.01, jnp.float32),
    }


if __name__ == "__main__":
    key = jax.random.PRNGKey(0)
    n_nodes, in_dim, hidden = 16, 8, 32

    k_x, k_p = jax.random.split(key)
    x = jax.random.normal(k_x, (n_nodes, in_dim), jnp.float32)

    # Deterministic ring graph, both directions: 2 * n_nodes edges.
    idx = np.arange(n_nodes)
    src = np.concatenate([idx, (idx + 1) % n_nodes])
    dst = np.concatenate([(idx + 1) % n_nodes, idx])
    edge_index = jnp.asarray(np.stack([src, dst]), dtype=jnp.int32)   # (2, 32)

    params = init_params(k_p, in_dim, hidden)

    out = jax.block_until_ready(saggnn_forward(x, edge_index, params))
    ref = jax.block_until_ready(saggnn_reference(x, edge_index, params))

    assert out.shape == (n_nodes, n_nodes)
    np.testing.assert_allclose(np.asarray(out), np.asarray(ref), atol=2e-3, rtol=2e-3)

    print("KERNEL_OK")
</pallas_src>

<mosaic_0001>
module attributes {stable_mosaic.version = 11 : i64} {
  func.func @node_kernel(%arg0: i32, %arg1: i32, %arg2: memref<128x128xbf16, #tpu.memory_space<vmem>>, %arg3: memref<128x1xf32, #tpu.memory_space<vmem>>, %arg4: memref<128x128xf32, #tpu.memory_space<vmem>>, %arg5: memref<128x128xf32, #tpu.memory_space<vmem>>, %arg6: memref<1x128xf32, #tpu.memory_space<vmem>>, %arg7: memref<128x128xf32, #tpu.memory_space<vmem>>, %arg8: memref<1x128xf32, #tpu.memory_space<vmem>>, %arg9: memref<128x128xf32, #tpu.memory_space<vmem>>, %arg10: memref<1x128xf32, #tpu.memory_space<vmem>>, %arg11: memref<128x1xf32, #tpu.memory_space<vmem>>, %arg12: memref<1x128xf32, #tpu.memory_space<vmem>>, %arg13: memref<1x1xf32, #tpu.memory_space<vmem>>, %arg14: memref<128x128xf32, #tpu.memory_space<vmem>>, %arg15: memref<128x128xf32, #tpu.memory_space<vmem>>, %arg16: memref<128x128xf32, #tpu.memory_space<vmem>>, %arg17: memref<128x128xf32, #tpu.memory_space<vmem>>) attributes {dimension_semantics = [#tpu.dimension_semantics<arbitrary>, #tpu.dimension_semantics<arbitrary>], iteration_bounds = array<i64: 2, 1>, scalar_prefetch = 0 : i64, scratch_operands = 3 : i64, tpu.core_type = #tpu.core_type<tc>, window_params = [{transform_indices = @transform_0, window_bounds = array<i64: 128, 128>}, {pipeline_mode = #tpu.pipeline_mode<synchronous>, transform_indices = @transform_1, window_bounds = array<i64: 128, 1>}, {transform_indices = @transform_2, window_bounds = array<i64: 128, 128>}, {pipeline_mode = #tpu.pipeline_mode<synchronous>, transform_indices = @transform_3, window_bounds = array<i64: 128, 128>}, {pipeline_mode = #tpu.pipeline_mode<synchronous>, transform_indices = @transform_4, window_bounds = array<i64: 1, 128>}, {pipeline_mode = #tpu.pipeline_mode<synchronous>, transform_indices = @transform_5, window_bounds = array<i64: 128, 128>}, {pipeline_mode = #tpu.pipeline_mode<synchronous>, transform_indices = @transform_6, window_bounds = array<i64: 1, 128>}, {pipeline_mode = #tpu.pipeline_mode<synchronous>, transform_indices = @transform_7, window_bounds = array<i64: 128, 128>}, {pipeline_mode = #tpu.pipeline_mode<synchronous>, transform_indices = @transform_8, window_bounds = array<i64: 1, 128>}, {pipeline_mode = #tpu.pipeline_mode<synchronous>, transform_indices = @transform_9, window_bounds = array<i64: 128, 1>}, {pipeline_mode = #tpu.pipeline_mode<synchronous>, transform_indices = @transform_10, window_bounds = array<i64: 1, 128>}, {pipeline_mode = #tpu.pipeline_mode<synchronous>, transform_indices = @transform_11, window_bounds = array<i64: 1, 1>}, {pipeline_mode = #tpu.pipeline_mode<synchronous>, transform_indices = @transform_12, window_bounds = array<i64: 128, 128>}]} {
    %c0_i32 = arith.constant 0 : i32
    %0 = arith.cmpi eq, %arg1, %c0_i32 : i32
    %1 = arith.extui %0 : i1 to i32
    %c0_i32_0 = arith.constant 0 : i32
    %2 = arith.cmpi ne, %1, %c0_i32_0 : i32
    scf.if %2 {
      %cst_18 = arith.constant 0.000000e+00 : f32
      %32 = vector.broadcast %cst_18 : f32 to vector<128x128xf32>
      %c0_19 = arith.constant 0 : index
      %c0_20 = arith.constant 0 : index
      %33 = vector.load %arg15[%c0_19, %c0_20] : memref<128x128xf32, #tpu.memory_space<vmem>>, vector<128x128xf32>
      tpu.vector_store %arg15[%c0_19, %c0_20], %32 {strides = array<i32>} : memref<128x128xf32, #tpu.memory_space<vmem>>, vector<128x128xf32>,
    } else {
    }
    %c128_i32 = arith.constant 128 : i32
    %3 = arith.muli %arg1, %c128_i32 : i32
    %4 = tpu.assume_multiple %3, 128 : i32
    %5 = arith.index_cast %4 : i32 to index
    %c0 = arith.constant 0 : index
    %6 = vector.load %arg3[%5, %c0] : memref<128x1xf32, #tpu.memory_space<vmem>>, vector<128x1xf32>
    %c0_i32_1 = arith.constant 0 : i32
    %7 = arith.cmpi eq, %arg0, %c0_i32_1 : i32
    %8 = arith.extui %7 : i1 to i32
    %c0_i32_2 = arith.constant 0 : i32
    %9 = arith.cmpi ne, %8, %c0_i32_2 : i32
    scf.if %9 {
      %c0_18 = arith.constant 0 : index
      %c0_19 = arith.constant 0 : index
      %32 = vector.load %arg4[%c0_18, %c0_19] : memref<128x128xf32, #tpu.memory_space<vmem>>, vector<128x128xf32>
      %c0_20 = arith.constant 0 : index
      %c0_21 = arith.constant 0 : index
      %33 = vector.load %arg5[%c0_20, %c0_21] : memref<128x128xf32, #tpu.memory_space<vmem>>, vector<128x128xf32>
      %cst_22 = arith.constant dense<0.000000e+00> : vector<128x128xf32>
      %34 = tpu.matmul %32, %33, %cst_22 {dimension_numbers = #tpu.dot_dimension_numbers<[1], [0], [0], [1], [0, 0, 1, 1], [], []>} : vector<128x128xf32>, vector<128x128xf32>, vector<128x128xf32> -> vector<128x128xf32>
      %c0_23 = arith.constant 0 : index
      %c0_24 = arith.constant 0 : index
      %35 = vector.load %arg17[%c0_23, %c0_24] : memref<128x128xf32, #tpu.memory_space<vmem>>, vector<128x128xf32>
      tpu.vector_store %arg17[%c0_23, %c0_24], %34 {strides = array<i32>} : memref<128x128xf32, #tpu.memory_space<vmem>>, vector<128x128xf32>,
    } else {
    }
    %c1_i32 = arith.constant 1 : i32
    %10 = arith.cmpi eq, %arg0, %c1_i32 : i32
    %11 = arith.extui %10 : i1 to i32
    %c0_i32_3 = arith.constant 0 : i32
    %12 = arith.cmpi ne, %11, %c0_i32_3 : i32
    scf.if %12 {
      %32 = arith.index_cast %4 : i32 to index
      %c0_18 = arith.constant 0 : index
      %33 = vector.load %arg16[%32, %c0_18] : memref<128x128xf32, #tpu.memory_space<vmem>>, vector<128x128xf32>
      %c0_19 = arith.constant 0 : index
      %c0_20 = arith.constant 0 : index
      %34 = vector.load %arg7[%c0_19, %c0_20] : memref<128x128xf32, #tpu.memory_space<vmem>>, vector<128x128xf32>
      %cst_21 = arith.constant dense<0.000000e+00> : vector<128x128xf32>
      %35 = tpu.matmul %33, %34, %cst_21 {dimension_numbers = #tpu.dot_dimension_numbers<[1], [0], [0], [1], [0, 0, 1, 1], [], []>} : vector<128x128xf32>, vector<128x128xf32>, vector<128x128xf32> -> vector<128x128xf32>
      %c0_22 = arith.constant 0 : index
      %c0_23 = arith.constant 0 : index
      %36 = vector.load %arg17[%c0_22, %c0_23] : memref<128x128xf32, #tpu.memory_space<vmem>>, vector<128x128xf32>
      tpu.vector_store %arg17[%c0_22, %c0_23], %35 {strides = array<i32>} : memref<128x128xf32, #tpu.memory_space<vmem>>, vector<128x128xf32>,
    } else {
    }
    %c0_4 = arith.constant 0 : index
    %c0_5 = arith.constant 0 : index
    %13 = vector.load %arg17[%c0_4, %c0_5] : memref<128x128xf32, #tpu.memory_space<vmem>>, vector<128x128xf32>
    %14 = vector.broadcast %6 : vector<128x1xf32> to vector<128x128xf32>
    %15 = arith.mulf %13, %14 : vector<128x128xf32>
    %16 = arith.truncf %15 : vector<128x128xf32> to vector<128x128xbf16>
    %c0_6 = arith.constant 0 : index
    %c0_7 = arith.constant 0 : index
    %17 = vector.load %arg15[%c0_6, %c0_7] : memref<128x128xf32, #tpu.memory_space<vmem>>, vector<128x128xf32>
    %c0_8 = arith.constant 0 : index
    %c0_9 = arith.constant 0 : index
    %18 = vector.load %arg2[%c0_8, %c0_9] : memref<128x128xbf16, #tpu.memory_space<vmem>>, vector<128x128xbf16>
    %cst = arith.constant dense<0.000000e+00> : vector<128x128xf32>
    %19 = tpu.matmul %18, %16, %cst {dimension_numbers = #tpu.dot_dimension_numbers<[1], [0], [0], [1], [0, 0, 1, 1], [], []>} : vector<128x128xbf16>, vector<128x128xbf16>, vector<128x128xf32> -> vector<128x128xf32>
    %20 = arith.addf %17, %19 : vector<128x128xf32>
    %c0_10 = arith.constant 0 : index
    %c0_11 = arith.constant 0 : index
    %21 = vector.load %arg15[%c0_10, %c0_11] : memref<128x128xf32, #tpu.memory_space<vmem>>, vector<128x128xf32>
    tpu.vector_store %arg15[%c0_10, %c0_11], %20 {strides = array<i32>} : memref<128x128xf32, #tpu.memory_space<vmem>>, vector<128x128xf32>,
    %c0_i32_12 = arith.constant 0 : i32
    %22 = arith.cmpi eq, %arg0, %c0_i32_12 : i32
    %c0_i32_13 = arith.constant 0 : i32
    %23 = arith.cmpi eq, %arg1, %c0_i32_13 : i32
    %24 = arith.andi %22, %23 : i1
    %25 = arith.extui %24 : i1 to i32
    %c0_i32_14 = arith.constant 0 : i32
    %26 = arith.cmpi ne, %25, %c0_i32_14 : i32
    scf.if %26 {
      %c0_18 = arith.constant 0 : index
      %c0_19 = arith.constant 0 : index
      %32 = vector.load %arg3[%c0_18, %c0_19] : memref<128x1xf32, #tpu.memory_space<vmem>>, vector<128x1xf32>
      %c0_20 = arith.constant 0 : index
      %c0_21 = arith.constant 0 : index
      %33 = vector.load %arg15[%c0_20, %c0_21] : memref<128x128xf32, #tpu.memory_space<vmem>>, vector<128x128xf32>
      %34 = vector.broadcast %32 : vector<128x1xf32> to vector<128x128xf32>
      %35 = arith.mulf %34, %33 : vector<128x128xf32>
      %c0_22 = arith.constant 0 : index
      %c0_23 = arith.constant 0 : index
      %36 = vector.load %arg6[%c0_22, %c0_23] : memref<1x128xf32, #tpu.memory_space<vmem>>, vector<1x128xf32>
      %37 = vector.broadcast %36 : vector<1x128xf32> to vector<128x128xf32>
      %38 = arith.addf %35, %37 : vector<128x128xf32>
      %cst_24 = arith.constant 0.000000e+00 : f32
      %39 = vector.broadcast %cst_24 : f32 to vector<128x128xf32>
      %40 = arith.maximumf %38, %39 : vector<128x128xf32>
      %c0_25 = arith.constant 0 : index
      %c0_26 = arith.constant 0 : index
      %41 = vector.load %arg16[%c0_25, %c0_26] : memref<128x128xf32, #tpu.memory_space<vmem>>, vector<128x128xf32>
      tpu.vector_store %arg16[%c0_25, %c0_26], %40 {strides = array<i32>} : memref<128x128xf32, #tpu.memory_space<vmem>>, vector<128x128xf32>,
    } else {
    }
    %c1_i32_15 = arith.constant 1 : i32
    %27 = arith.cmpi eq, %arg0, %c1_i32_15 : i32
    %c0_i32_16 = arith.constant 0 : i32
    %28 = arith.cmpi eq, %arg1, %c0_i32_16 : i32
    %29 = arith.andi %27, %28 : i1
    %30 = arith.extui %29 : i1 to i32
    %c0_i32_17 = arith.constant 0 : i32
    %31 = arith.cmpi ne, %30, %c0_i32_17 : i32
    scf.if %31 {
      %c0_18 = arith.constant 0 : index
      %c0_19 = arith.constant 0 : index
      %32 = vector.load %arg3[%c0_18, %c0_19] : memref<128x1xf32, #tpu.memory_space<vmem>>, vector<128x1xf32>
      %c0_20 = arith.constant 0 : index
      %c0_21 = arith.constant 0 : index
      %33 = vector.load %arg15[%c0_20, %c0_21] : memref<128x128xf32, #tpu.memory_space<vmem>>, vector<128x128xf32>
      %34 = vector.broadcast %32 : vector<128x1xf32> to vector<128x128xf32>
      %35 = arith.mulf %34, %33 : vector<128x128xf32>
      %c0_22 = arith.constant 0 : index
      %c0_23 = arith.constant 0 : index
      %36 = vector.load %arg8[%c0_22, %c0_23] : memref<1x128xf32, #tpu.memory_space<vmem>>, vector<1x128xf32>
      %37 = vector.broadcast %36 : vector<1x128xf32> to vector<128x128xf32>
      %38 = arith.addf %35, %37 : vector<128x128xf32>
      %cst_24 = arith.constant 0.000000e+00 : f32
      %39 = vector.broadcast %cst_24 : f32 to vector<128x128xf32>
      %40 = arith.maximumf %38, %39 : vector<128x128xf32>
      %c0_25 = arith.constant 0 : index
      %c0_26 = arith.constant 0 : index
      %41 = vector.load %arg9[%c0_25, %c0_26] : memref<128x128xf32, #tpu.memory_space<vmem>>, vector<128x128xf32>
      %cst_27 = arith.constant dense<0.000000e+00> : vector<128x128xf32>
      %42 = tpu.matmul %40, %41, %cst_27 {dimension_numbers = #tpu.dot_dimension_numbers<[1], [0], [0], [1], [0, 0, 1, 1], [], []>} : vector<128x128xf32>, vector<128x128xf32>, vector<128x128xf32> -> vector<128x128xf32>
      %c0_28 = arith.constant 0 : index
      %c0_29 = arith.constant 0 : index
      %43 = vector.load %arg10[%c0_28, %c0_29] : memref<1x128xf32, #tpu.memory_space<vmem>>, vector<1x128xf32>
      %44 = vector.broadcast %43 : vector<1x128xf32> to vector<128x128xf32>
      %45 = arith.addf %42, %44 : vector<128x128xf32>
      %c0_30 = arith.constant 0 : index
      %c0_31 = arith.constant 0 : index
      %46 = vector.load %arg11[%c0_30, %c0_31] : memref<128x1xf32, #tpu.memory_space<vmem>>, vector<128x1xf32>
      %cst_32 = arith.constant dense<0.000000e+00> : vector<128x1xf32>
      %47 = tpu.matmul %45, %46, %cst_32 {dimension_numbers = #tpu.dot_dimension_numbers<[1], [0], [0], [1], [0, 0, 1, 1], [], []>} : vector<128x128xf32>, vector<128x1xf32>, vector<128x1xf32> -> vector<128x1xf32>
      %c0_33 = arith.constant 0 : index
      %c0_34 = arith.constant 0 : index
      %48 = vector.load %arg13[%c0_33, %c0_34] : memref<1x1xf32, #tpu.memory_space<vmem>>, vector<1x1xf32>
      %49 = vector.broadcast %48 : vector<1x1xf32> to vector<128x1xf32>
      %50 = arith.addf %47, %49 : vector<128x1xf32>
      %c0_35 = arith.constant 0 : index
      %c0_36 = arith.constant 0 : index
      %51 = vector.load %arg12[%c0_35, %c0_36] : memref<1x128xf32, #tpu.memory_space<vmem>>, vector<1x128xf32>
      %cst_37 = arith.constant dense<0.000000e+00> : vector<1x128xf32>
      %52 = tpu.matmul %51, %45, %cst_37 {dimension_numbers = #tpu.dot_dimension_numbers<[1], [1], [0], [0], [0, 0, 1, 0], [], []>} : vector<1x128xf32>, vector<128x128xf32>, vector<1x128xf32> -> vector<1x128xf32>
      %53 = vector.broadcast %50 : vector<128x1xf32> to vector<128x128xf32>
      %54 = vector.broadcast %52 : vector<1x128xf32> to vector<128x128xf32>
      %55 = arith.addf %53, %54 : vector<128x128xf32>
      %c0_38 = arith.constant 0 : index
      %c0_39 = arith.constant 0 : index
      %56 = vector.load %arg14[%c0_38, %c0_39] : memref<128x128xf32, #tpu.memory_space<vmem>>, vector<128x128xf32>
      tpu.vector_store %arg14[%c0_38, %c0_39], %55 {strides = array<i32>} : memref<128x128xf32, #tpu.memory_space<vmem>>, vector<128x128xf32>,
    } else {
    }
    return
  }
  func.func @transform_0(%arg0: i32, %arg1: i32) -> (i32, i32) {
    %c0_i32 = arith.constant 0 : i32
    %c0_i32_0 = arith.constant 0 : i32
    return %c0_i32, %arg1 : i32, i32
  }
  func.func @transform_1(%arg0: i32, %arg1: i32) -> (i32, i32) {
    %c0_i32 = arith.constant 0 : i32
    %c0_i32_0 = arith.constant 0 : i32
    %c0_i32_1 = arith.constant 0 : i32
    return %c0_i32, %c0_i32_0 : i32, i32
  }
  func.func @transform_2(%arg0: i32, %arg1: i32) -> (i32, i32) {
    %c1_i32 = arith.constant 1 : i32
    %0 = arith.subi %c1_i32, %arg0 : i32
    %1 = arith.muli %arg1, %0 : i32
    %c0_i32 = arith.constant 0 : i32
    %c0_i32_0 = arith.constant 0 : i32
    return %1, %c0_i32 : i32, i32
  }
  func.func @transform_3(%arg0: i32, %arg1: i32) -> (i32, i32) {
    %c0_i32 = arith.constant 0 : i32
    %c0_i32_0 = arith.constant 0 : i32
    %c0_i32_1 = arith.constant 0 : i32
    return %c0_i32, %c0_i32_0 : i32, i32
  }
  func.func @transform_4(%arg0: i32, %arg1: i32) -> (i32, i32) {
    %c0_i32 = arith.constant 0 : i32
    %c0_i32_0 = arith.constant 0 : i32
    %c0_i32_1 = arith.constant 0 : i32
    return %c0_i32, %c0_i32_0 : i32, i32
  }
  func.func @transform_5(%arg0: i32, %arg1: i32) -> (i32, i32) {
    %c0_i32 = arith.constant 0 : i32
    %c0_i32_0 = arith.constant 0 : i32
    %c0_i32_1 = arith.constant 0 : i32
    return %c0_i32, %c0_i32_0 : i32, i32
  }
  func.func @transform_6(%arg0: i32, %arg1: i32) -> (i32, i32) {
    %c0_i32 = arith.constant 0 : i32
    %c0_i32_0 = arith.constant 0 : i32
    %c0_i32_1 = arith.constant 0 : i32
    return %c0_i32, %c0_i32_0 : i32, i32
  }
  func.func @transform_7(%arg0: i32, %arg1: i32) -> (i32, i32) {
    %c0_i32 = arith.constant 0 : i32
    %c0_i32_0 = arith.constant 0 : i32
    %c0_i32_1 = arith.constant 0 : i32
    return %c0_i32, %c0_i32_0 : i32, i32
  }
  func.func @transform_8(%arg0: i32, %arg1: i32) -> (i32, i32) {
    %c0_i32 = arith.constant 0 : i32
    %c0_i32_0 = arith.constant 0 : i32
    %c0_i32_1 = arith.constant 0 : i32
    return %c0_i32, %c0_i32_0 : i32, i32
  }
  func.func @transform_9(%arg0: i32, %arg1: i32) -> (i32, i32) {
    %c0_i32 = arith.constant 0 : i32
    %c0_i32_0 = arith.constant 0 : i32
    %c0_i32_1 = arith.constant 0 : i32
    return %c0_i32, %c0_i32_0 : i32, i32
  }
  func.func @transform_10(%arg0: i32, %arg1: i32) -> (i32, i32) {
    %c0_i32 = arith.constant 0 : i32
    %c0_i32_0 = arith.constant 0 : i32
    %c0_i32_1 = arith.constant 0 : i32
    return %c0_i32, %c0_i32_0 : i32, i32
  }
  func.func @transform_11(%arg0: i32, %arg1: i32) -> (i32, i32) {
    %c0_i32 = arith.constant 0 : i32
    %c0_i32_0 = arith.constant 0 : i32
    %c0_i32_1 = arith.constant 0 : i32
    return %c0_i32, %c0_i32_0 : i32, i32
  }
  func.func @transform_12(%arg0: i32, %arg1: i32) -> (i32, i32) {
    %c0_i32 = arith.constant 0 : i32
    %c0_i32_0 = arith.constant 0 : i32
    %c0_i32_1 = arith.constant 0 : i32
    return %c0_i32, %c0_i32_0 : i32, i32
  }
}

</mosaic_0001>

<bundles_post_ra>
// kernel: tpu_custom_call.1
= control target key start
LH: loop header
LB: loop body
LE: loop exit
PB: predicated region body
PF: predicated region fallthrough
CT: control target
= control target key end

     0   :  { %s3789_s0 = inlined_call_operand.hbm [shape: bf16[128,128], index: 0, kind: input, shape index: {}]   ;;  %s3790_s1 = inlined_call_operand.vmem [shape: f32[128,1], index: 1, kind: input, shape index: {}]   ;;  %s3791_s2 = inlined_call_operand.vmem [shape: f32[128,128], index: 2, kind: input, shape index: {}]   ;;  %s3792_s3 = inlined_call_operand.vmem [shape: f32[128,128], index: 3, kind: input, shape index: {}]   ;;  %s3793_s4 = inlined_call_operand.vmem [shape: f32[1,128], index: 4, kind: input, shape index: {}]   ;;  %s3794_s5 = inlined_call_operand.hbm [shape: f32[128,128], index: 5, kind: input, shape index: {}]   ;;  %s3795_s6 = inlined_call_operand.vmem [shape: f32[1,128], index: 6, kind: input, shape index: {}]   ;;  %s3796_s7 = inlined_call_operand.hbm [shape: f32[128,128], index: 7, kind: input, shape index: {}]   ;;  %s3797_s8 = inlined_call_operand.vmem [shape: f32[1,128], index: 8, kind: input, shape index: {}]   ;;  %s3798_s9 = inlined_call_operand.vmem [shape: f32[128,1], index: 9, kind: input, shape index: {}]   ;;  %s3799_s10 = inlined_call_operand.vmem [shape: f32[1,128], index: 10, kind: input, shape index: {}]   ;;  %s3800_s11 = inlined_call_operand.<no memory space> [shape: f32[1,1], index: 11, kind: input, shape index: {}]   ;;  %s3801_s12 = inlined_call_operand.hbm [shape: f32[128,128], index: 12, kind: output, shape index: {}]  }
   0x1   :  { %3811 = sst [smem:[#allocation18_spill]] %s3801_s12  ;;  %v17_v0 = vstv %s3800_s11 }
   0x2   :  { %18 = vst [vmem:[#allocation5] sm:$0x1] %v17_v0 }
   0x3   :  { %19 = vsyncpa [#allocation7], 0 }
   0x4   :  { %20 = vsyncpa [#allocation10], 0 }
   0x5   :  { %21 = vsyncpa [#allocation8], 0  ;;  %s3224_s23 = smov 0   ;;  %s3226_s24 = smov 0  }
   0x6   :  { %s3228_s25 = smov 0  }
   0x7 LB: > { %3812 = sst [smem:[#allocation16_spill]] %s3133_s24  ;;  %s3139_s11 = smov [#allocation9]   ;;  %s3137_s25 = sphi %s3228_s25, %s27_s25   ;;  %s3133_s24 = sphi %s3226_s24, %s3829_s24   ;;  %s3129_s23 = sphi %s3224_s23, %s3828_s23  }
   0x8   : > { %3813 = sst [smem:[#allocation17_spill]] %s3137_s25  ;;  %s367_s26 = sshll.u32 %s3139_s11, 4  ;;  %s3248_s26 = int_to_ptr.vmem [resolvable:$true] %s367_s26 }
   0x9   : > { %s3802_s27 = sadd.s32 4294967295, %s3137_s25   ;;  %p2220_p0 = scmp.ge.s32.totalorder %s3137_s25, 1 }
   0xa   : > { %p331_p1 = scmp.lt.s32.totalorder %s3137_s25, 3  ;;  %p3244_p2 = scmp.eq.s32.totalorder %s3802_s27, 0 }
   0xb   : > { %s39_s13 = sadd.s32 1, %s3133_s24  ;;  %s3140_s15 = smov [#allocation6]  }
   0xc   : > { %s3814_s28 = scalar_select %p3244_p2, 1, 0 }
   0xd   : > { %p3250_p3 = pnand %p2220_p0, %p331_p1  ;;  %p3263_p6 = scmp.ge.s32.totalorder %s39_s13, 2 }
   0xe   : > { %s345_s16 = sshll.u32 %s3140_s15, 4  ;;  %s2993_s19 = scalar_lea.hbm %s3794_s5, 2048  ;;  %s346_s16 = int_to_ptr.vmem [resolvable:$true] %s345_s16 }
   0xf   : > { %s3815_s29 = scalar_select %p3250_p3, 1, 0 }
  0x10   : > { %p2920_p4 = pneg %p3250_p3  ;;  %p2994_p7 = scmp.ne.s32.totalorder %s3794_s5, %s2993_s19 }
  0x11   : > { %p3000_p11 = scmp.lt.u32.totalorder %s2993_s19, %s3794_s5 }
  0x12   : > { %p3258_p5 = pnand %p3244_p2, %p2920_p4 }
  0x14   : > { %p3275_p8 = pneg %p3258_p5 }
  0x16   : > { %p2996_p9 = pnand %p3275_p8, %p2994_p7 }
  0x18   : > { %p2997_p10 = pneg %p2996_p9 }
  0x1a   : > { %p3002_p12 = pnand %p3000_p11, %p2997_p10 }
  0x1c   : > { %3005 = shalt.err (!%p3002_p12)
}
  0x1d   : > { %s3006_s15 = scalar_lea.vmem %s3248_s26, 2048  ;;  %p3014_p4 = scmp.lt.s32.totalorder %s3248_s26, %s3248_s26 }
  0x1e   : > { %p3007_p13 = scmp.ne.s32.totalorder %s3248_s26, %s3006_s15  ;;  %p3015_p2 = scmp.lt.s32.totalorder %s3006_s15, %s3006_s15 }
  0x20   : > { %p3009_p0 = pnand %p3007_p13, %p3275_p8  ;;  %p3016_p7 = por %p3015_p2, %p3014_p4 }
  0x22   : > { %p3010_p1 = pneg %p3009_p0 }
  0x24   : > { %p3017_p9 = pnand %p3016_p7, %p3010_p1 }
  0x26   : > { %3020 = shalt.err (!%p3017_p9)
}
  0x27   : > { %s3809_s17 = smov 128   ;;  %s3810_s27 = smov 8  }
  0x28   : > { %2926 = dma.hbm_to_vmem [thread:$0]  (!%p3258_p5), %s3794_s5, 2048, %s3248_s26, [#allocation10], %s3809_s17, %s3809_s17, %s3810_s27  }
  0x29   : > { %s3831_s13 = smov (%p3263_p6, %s39_s13), 0  ;;  %s3021_s11 = scalar_lea.hbm %s3789_s0, 1024 }
  0x2a   : > { %p3022_p2 = scmp.ne.s32.totalorder %s3789_s0, %s3021_s11  ;;  %p3028_p12 = scmp.lt.u32.totalorder %s3021_s11, %s3789_s0 }
  0x2c   : > { %p3024_p10 = pnand %p3022_p2, %p3275_p8 }
  0x2e   : > { %p3025_p11 = pneg %p3024_p10 }
  0x30   : > { %p3030_p13 = pnand %p3028_p12, %p3025_p11 }
  0x32   : > { %3033 = shalt.err (!%p3030_p13)
}
  0x33   : > { %s3034_s26 = scalar_lea.vmem %s346_s16, 1024  ;;  %p3042_p4 = scmp.lt.s32.totalorder %s346_s16, %s346_s16 }
  0x34   : > { %p3035_p6 = scmp.ne.s32.totalorder %s346_s16, %s3034_s26  ;;  %p3043_p7 = scmp.lt.s32.totalorder %s3034_s26, %s3034_s26 }
  0x36   : > { %p3037_p0 = pnand %p3035_p6, %p3275_p8  ;;  %p3044_p9 = por %p3043_p7, %p3042_p4 }
  0x38   : > { %p3038_p1 = pneg %p3037_p0 }
  0x3a   : > { %p3045_p3 = pnand %p3044_p9, %p3038_p1 }
  0x3c   : > { %3048 = shalt.err (!%p3045_p3)
}
  0x3d   : > { %s3143_s24 = smov 64   ;;  %s3144_s14 = smov 4  }
  0x3e   : > { %2923 = dma.hbm_to_vmem [thread:$0]  (!%p3258_p5), %s3789_s0, 1024, %s346_s16, [#allocation7], %s3143_s24, %s3143_s24, %s3144_s14  }
  0x3f   : > { %s3145_s18 = smov [#allocation11]   ;;  %s3049_s11 = scalar_lea.hbm %s3796_s7, 2048 }
  0x40   : > { %s383_s19 = sshll.u32 %s3145_s18, 4  ;;  %p3050_p3 = scmp.ne.s32.totalorder %s3796_s7, %s3049_s11  ;;  %s384_s19 = int_to_ptr.vmem [resolvable:$true] %s383_s19 }
  0x41   : > { %p3056_p11 = scmp.lt.u32.totalorder %s3049_s11, %s3796_s7 }
  0x42   : > { %p3052_p2 = pnand %p3050_p3, %p3275_p8 }
  0x44   : > { %p3053_p10 = pneg %p3052_p2 }
  0x46   : > { %p3058_p12 = pnand %p3056_p11, %p3053_p10 }
  0x48   : > { %3061 = shalt.err (!%p3058_p12)
}
  0x49   : > { %s3062_s16 = scalar_lea.vmem %s384_s19, 2048  ;;  %p3070_p1 = scmp.lt.s32.totalorder %s384_s19, %s384_s19 }
  0x4a   : > { %p3063_p13 = scmp.ne.s32.totalorder %s384_s19, %s3062_s16  ;;  %p3071_p4 = scmp.lt.s32.totalorder %s3062_s16, %s3062_s16 }
  0x4c   : > { %p3065_p6 = pnand %p3063_p13, %p3275_p8  ;;  %p3072_p7 = por %p3071_p4, %p3070_p1 }
  0x4e   : > { %p3066_p0 = pneg %p3065_p6 }
  0x50   : > { %p3073_p9 = pnand %p3072_p7, %p3066_p0 }
  0x52   : > { %3076 = shalt.err (!%p3073_p9)
}
  0x53   : > { %s3819_s24 = smov 8   ;;  %s3820_s14 = smov 128  }
  0x54   : > { %2929 = dma.hbm_to_vmem [thread:$0]  (!%p3258_p5), %s3796_s7, 2048, %s384_s19, [#allocation10], %s3820_s14, %s3820_s14, %s3819_s24  }
  0x55   : > { %p3821_p3 = scmp.ne.s32.totalorder %s3815_s29, 0 }
  0x56   : > { %p3822_p8 = scmp.ne.s32.totalorder (!%p3821_p3), %s3814_s28, 0 }
  0x57   : > { %424 = sbr.rel (%p3821_p3) target bundleno = 1912 (0x778), region = 68 }
  0x5e   : > { %3116 = dma.done.wait (%p3822_p8), [#allocation7], 1024  }
  0x5f   : > { %3118 = vsyncadd (%p3822_p8), [#allocation7], 4294966272 }
  0x60   : > { %3120 = dma.done.wait (%p3822_p8), [#allocation10], 4096  }
  0x61   : > { %3122 = vsyncadd (%p3822_p8), [#allocation10], 4294963200  ;;  %p520_p2 = scmp.eq.s32.totalorder %s3129_s23, 0  ;;  %v3146_v1 = vmov 0.0   ;;  %v3356_v2 = vld [vmem:[%s3790_s1] sm:$0xff]  ;;  %v3361_v3 = vld [vmem:[%s3790_s1 + $0x8] sm:$0xff] }
  0x62   : > { %486 = vst [vmem:[#allocation2] sm:$0xff] %v3146_v1  ;;  %487 = vst [vmem:[#allocation2 + $0x8] sm:$0xff] %v3146_v1  ;;  %v3366_v4 = vld [vmem:[%s3790_s1 + $0x10] sm:$0xff]  ;;  %v3371_v5 = vld [vmem:[%s3790_s1 + $0x18] sm:$0xff]  ;;  %p2230_p5 = scmp.ne.s32.totalorder %s3129_s23, 0 }
  0x63   : > { %488 = vst [vmem:[#allocation2 + $0x10] sm:$0xff] %v3146_v1  ;;  %489 = vst [vmem:[#allocation2 + $0x18] sm:$0xff] %v3146_v1  ;;  %v3376_v6 = vld [vmem:[%s3790_s1 + $0x20] sm:$0xff]  ;;  %v3381_v7 = vld [vmem:[%s3790_s1 + $0x28] sm:$0xff] }
  0x64   : > { %490 = vst [vmem:[#allocation2 + $0x20] sm:$0xff] %v3146_v1  ;;  %491 = vst [vmem:[#allocation2 + $0x28] sm:$0xff] %v3146_v1  ;;  %v3386_v8 = vld [vmem:[%s3790_s1 + $0x30] sm:$0xff]  ;;  %v3391_v9 = vld [vmem:[%s3790_s1 + $0x38] sm:$0xff]  ;;  %523 = sbr.rel (%p2230_p5) target bundleno = 366 (0x16e), region = 88 }
  0x65   : > { %492 = vst [vmem:[#allocation2 + $0x30] sm:$0xff] %v3146_v1  ;;  %493 = vst [vmem:[#allocation2 + $0x38] sm:$0xff] %v3146_v1  ;;  %v3396_v10 = vld [vmem:[%s3790_s1 + $0x40] sm:$0xff]  ;;  %v3401_v11 = vld [vmem:[%s3790_s1 + $0x48] sm:$0xff] }
  0x66   : > { %494 = vst [vmem:[#allocation2 + $0x40] sm:$0xff] %v3146_v1  ;;  %495 = vst [vmem:[#allocation2 + $0x48] sm:$0xff] %v3146_v1  ;;  %v3406_v12 = vld [vmem:[%s3790_s1 + $0x50] sm:$0xff]  ;;  %v3411_v13 = vld [vmem:[%s3790_s1 + $0x58] sm:$0xff] }
  0x67   : > { %496 = vst [vmem:[#allocation2 + $0x50] sm:$0xff] %v3146_v1  ;;  %497 = vst [vmem:[#allocation2 + $0x58] sm:$0xff] %v3146_v1  ;;  %v3416_v14 = vld [vmem:[%s3790_s1 + $0x60] sm:$0xff]  ;;  %v3421_v15 = vld [vmem:[%s3790_s1 + $0x68] sm:$0xff] }
  0x68   : > { %498 = vst [vmem:[#allocation2 + $0x60] sm:$0xff] %v3146_v1  ;;  %499 = vst [vmem:[#allocation2 + $0x68] sm:$0xff] %v3146_v1  ;;  %v3426_v16 = vld [vmem:[%s3790_s1 + $0x70] sm:$0xff]  ;;  %v3431_v17 = vld [vmem:[%s3790_s1 + $0x78] sm:$0xff] }
  0x69   : > { %500 = vst [vmem:[#allocation2 + $0x70] sm:$0xff] %v3146_v1  ;;  %501 = vst [vmem:[#allocation2 + $0x78] sm:$0xff] %v3146_v1  ;;  %v540_v18 = vld [vmem:[%s3792_s3] sm:$0xff] (!%p2230_p5)  ;;  %v541_v19 = vld [vmem:[%s3792_s3 + $0x8] sm:$0xff] (!%p2230_p5) }
  0x6a   : > { %v542_v20 = vld [vmem:[%s3792_s3 + $0x10] sm:$0xff] (!%p2230_p5)  ;;  %v2704_v21 = vpack.c.bf16 (!%p2230_p5), %v541_v19, %v540_v18  ;;  %v543_v22 = vld [vmem:[%s3792_s3 + $0x18] sm:$0xff] (!%p2230_p5)  ;;  %v544_v24 = vld [vmem:[%s3792_s3 + $0x20] sm:$0xff] (!%p2230_p5) }
  0x6b   : > { %v2708_v23 = vpack.c.bf16 %v543_v22, %v542_v20  ;;  %v545_v25 = vld [vmem:[%s3792_s3 + $0x28] sm:$0xff]  ;;  %v524_v27 = vld [vmem:[%s3791_s2] sm:$0xff]  ;;  %v546_v29 = vld [vmem:[%s3792_s3 + $0x30] sm:$0xff] }
  0x6c   : > { %2705 = vmatprep.subr.bf16.mxu0 %v2704_v21  ;;  %2856 = vmatprep.subr.bf16.mxu1 %v2704_v21  ;;  %v2712_v26 = vpack.c.bf16 %v545_v25, %v544_v24  ;;  %v532_v28 = vld [vmem:[%s3791_s2 + $0x40] sm:$0xff]  ;;  %v547_v30 = vld [vmem:[%s3792_s3 + $0x38] sm:$0xff]  ;;  %v549_v33 = vld [vmem:[%s3792_s3 + $0x48] sm:$0xff] }
  0x6d   : > { %2707 = vmatpush3.bf16.msra.mxu0 %v2704_v21  ;;  %2864 = vmatpush3.bf16.msra.mxu1 %v2704_v21  ;;  %v2716_v31 = vpack.c.bf16 %v547_v30, %v546_v29  ;;  %v548_v32 = vld [vmem:[%s3792_s3 + $0x40] sm:$0xff]  ;;  %v550_v35 = vld [vmem:[%s3792_s3 + $0x50] sm:$0xff]  ;;  %v551_v36 = vld [vmem:[%s3792_s3 + $0x58] sm:$0xff] }
  0x6e   : > { %2709 = vmatprep.subr.bf16.mxu0 %v2708_v23  ;;  %2857 = vmatprep.subr.bf16.mxu1 %v2708_v23  ;;  %v2720_v34 = vpack.c.bf16 %v549_v33, %v548_v32  ;;  %v2724_v37 = vpack.c.bf16 %v551_v36, %v550_v35  ;;  %v552_v38 = vld [vmem:[%s3792_s3 + $0x60] sm:$0xff]  ;;  %v553_v39 = vld [vmem:[%s3792_s3 + $0x68] sm:$0xff]  ;;  %v554_v41 = vld [vmem:[%s3792_s3 + $0x70] sm:$0xff] }
  0x6f   : > { %2445 = vmatprep.mubr.f32.mxu0 %v524_v27  ;;  %2457 = vmatprep.mubr.f32.mxu1 %v532_v28  ;;  %v2728_v40 = vpack.c.bf16 %v553_v39, %v552_v38  ;;  %v555_v42 = vld [vmem:[%s3792_s3 + $0x78] sm:$0xff]  ;;  %v525_v44 = vld [vmem:[%s3791_s2 + $0x8] sm:$0xff]  ;;  %v526_v46 = vld [vmem:[%s3791_s2 + $0x10] sm:$0xff] }
  0x70   : > { %v2732_v43 = vpack.c.bf16 %v555_v42, %v554_v41  ;;  %v533_v45 = vld [vmem:[%s3791_s2 + $0x48] sm:$0xff]  ;;  %v534_v47 = vld [vmem:[%s3791_s2 + $0x50] sm:$0xff]  ;;  %v527_v48 = vld [vmem:[%s3791_s2 + $0x18] sm:$0xff] }
  0x71   : > { %2711 = vmatpush3.bf16.msra.mxu0 %v2708_v23  ;;  %2865 = vmatpush3.bf16.msra.mxu1 %v2708_v23  ;;  %v535_v49 = vld [vmem:[%s3791_s2 + $0x58] sm:$0xff]  ;;  %v528_v50 = vld [vmem:[%s3791_s2 + $0x20] sm:$0xff]  ;;  %v529_v52 = vld [vmem:[%s3791_s2 + $0x28] sm:$0xff] }
  0x72   : > { %2713 = vmatprep.subr.bf16.mxu0 %v2712_v26  ;;  %2858 = vmatprep.subr.bf16.mxu1 %v2712_v26  ;;  %v536_v51 = vld [vmem:[%s3791_s2 + $0x60] sm:$0xff]  ;;  %v537_v53 = vld [vmem:[%s3791_s2 + $0x68] sm:$0xff]  ;;  %v530_v54 = vld [vmem:[%s3791_s2 + $0x30] sm:$0xff] }
  0x73   : > { %v538_v55 = vld [vmem:[%s3791_s2 + $0x70] sm:$0xff]  ;;  %v531_v56 = vld [vmem:[%s3791_s2 + $0x38] sm:$0xff] }
  0x74   : > { %v539_v57 = vld [vmem:[%s3791_s2 + $0x78] sm:$0xff] }
  0x75   : > { %2715 = vmatpush3.bf16.msra.mxu0 %v2712_v26  ;;  %2866 = vmatpush3.bf16.msra.mxu1 %v2712_v26 }
  0x76   : > { %2717 = vmatprep.subr.bf16.mxu0 %v2716_v31  ;;  %2859 = vmatprep.subr.bf16.mxu1 %v2716_v31 }
  0x79   : > { %2719 = vmatpush3.bf16.msra.mxu0 %v2716_v31  ;;  %2867 = vmatpush3.bf16.msra.mxu1 %v2716_v31 }
  0x7a   : > { %2721 = vmatprep.subr.bf16.mxu0 %v2720_v34  ;;  %2860 = vmatprep.subr.bf16.mxu1 %v2720_v34 }
  0x7d   : > { %2723 = vmatpush3.bf16.msra.mxu0 %v2720_v34  ;;  %2868 = vmatpush3.bf16.msra.mxu1 %v2720_v34 }
  0x7e   : > { %2725 = vmatprep.subr.bf16.mxu0 %v2724_v37  ;;  %2861 = vmatprep.subr.bf16.mxu1 %v2724_v37 }
  0x81   : > { %2727 = vmatpush3.bf16.msra.mxu0 %v2724_v37  ;;  %2869 = vmatpush3.bf16.msra.mxu1 %v2724_v37 }
  0x82   : > { %2729 = vmatprep.subr.bf16.mxu0 %v2728_v40  ;;  %2862 = vmatprep.subr.bf16.mxu1 %v2728_v40 }
  0x85   : > { %2731 = vmatpush3.bf16.msra.mxu0 %v2728_v40  ;;  %2870 = vmatpush3.bf16.msra.mxu1 %v2728_v40 }
  0x86   : > { %2733 = vmatprep.subr.bf16.mxu0 %v2732_v43  ;;  %2863 = vmatprep.subr.bf16.mxu1 %v2732_v43 }
  0x89   : > { %2735 = vmatpush3.bf16.msra.mxu0 %v2732_v43  ;;  %2871 = vmatpush3.bf16.msra.mxu1 %v2732_v43 }
  0x8c   : > { %2446 = vmatmul.mubr.f32.vlgmr.msra.gmra.mrb[0].mxu0 %v525_v44  ;;  %2458 = vmatmul.mubr.f32.vlgmr.msra.gmra.mrb[0].mxu1 %v533_v45 }
  0x8d   : > { %2448 = vmatprep.mubr.f32.mxu0 %v526_v46  ;;  %2460 = vmatprep.mubr.f32.mxu1 %v534_v47 }
  0x90   : > { %2449 = vmatmul.mubr.f32.gmra.mrb[2].mxu0 %v527_v48  ;;  %2461 = vmatmul.mubr.f32.gmra.mrb[2].mxu1 %v535_v49 }
  0x91   : > { %2451 = vmatprep.mubr.f32.mxu0 %v528_v50  ;;  %2463 = vmatprep.mubr.f32.mxu1 %v536_v51 }
  0x94   : > { %2452 = vmatmul.mubr.f32.gmra.mrb[4].mxu0 %v529_v52  ;;  %2464 = vmatmul.mubr.f32.gmra.mrb[4].mxu1 %v537_v53 }
  0x95   : > { %2454 = vmatprep.mubr.f32.mxu0 %v530_v54  ;;  %2466 = vmatprep.mubr.f32.mxu1 %v538_v55 }
  0x98   : > { %2455 = vmatmul.mubr.f32.gmra.mrb[6].mxu0 %v531_v56  ;;  %2467 = vmatmul.mubr.f32.gmra.mrb[6].mxu1 %v539_v57 }
 0x15f   : > { %v2447_v58 = vpop.f32.mrb[0].mxu0  ;;  %v2459_v59 = vpop.f32.mrb[0].mxu1 }
 0x160   : > { %702 = vst [vmem:[#allocation4 + $0x8] sm:$0xff] %v2447_v58  ;;  %710 = vst [vmem:[#allocation4 + $0x48] sm:$0xff] %v2459_v59  ;;  %v622_v60 = vpop.f32.mrb[1].mxu0  ;;  %v662_v61 = vpop.f32.mrb[1].mxu1 }
 0x161   : > { %701 = vst [vmem:[#allocation4] sm:$0xff] %v622_v60  ;;  %709 = vst [vmem:[#allocation4 + $0x40] sm:$0xff] %v662_v61 }
 0x163   : > { %v2450_v62 = vpop.f32.mrb[2].mxu0  ;;  %v2462_v63 = vpop.f32.mrb[2].mxu1 }
 0x164   : > { %704 = vst [vmem:[#allocation4 + $0x18] sm:$0xff] %v2450_v62  ;;  %712 = vst [vmem:[#allocation4 + $0x58] sm:$0xff] %v2462_v63  ;;  %v632_v0 = vpop.f32.mrb[3].mxu0  ;;  %v672_v1 = vpop.f32.mrb[3].mxu1 }
 0x165   : > { %703 = vst [vmem:[#allocation4 + $0x10] sm:$0xff] %v632_v0  ;;  %711 = vst [vmem:[#allocation4 + $0x50] sm:$0xff] %v672_v1 }
 0x167   : > { %v2453_v18 = vpop.f32.mrb[4].mxu0  ;;  %v2465_v19 = vpop.f32.mrb[4].mxu1 }
 0x168   : > { %706 = vst [vmem:[#allocation4 + $0x28] sm:$0xff] %v2453_v18  ;;  %714 = vst [vmem:[#allocation4 + $0x68] sm:$0xff] %v2465_v19  ;;  %v642_v20 = vpop.f32.mrb[5].mxu0  ;;  %v682_v21 = vpop.f32.mrb[5].mxu1 }
 0x169   : > { %705 = vst [vmem:[#allocation4 + $0x20] sm:$0xff] %v642_v20  ;;  %713 = vst [vmem:[#allocation4 + $0x60] sm:$0xff] %v682_v21 }
 0x16b   : > { %v2456_v22 = vpop.f32.mrb[6].mxu0  ;;  %v2468_v23 = vpop.f32.mrb[6].mxu1 }
 0x16c   : > { %708 = vst [vmem:[#allocation4 + $0x38] sm:$0xff] %v2456_v22  ;;  %716 = vst [vmem:[#allocation4 + $0x78] sm:$0xff] %v2468_v23  ;;  %v652_v24 = vpop.f32.mrb[7].mxu0  ;;  %v692_v25 = vpop.f32.mrb[7].mxu1 }
 0x16d   : > { %707 = vst [vmem:[#allocation4 + $0x30] sm:$0xff] %v652_v24  ;;  %715 = vst [vmem:[#allocation4 + $0x70] sm:$0xff] %v692_v25 }
 0x16e PF: > { %p717_p10 = scmp.eq.s32.totalorder %s3129_s23, 1  ;;  %p2231_p11 = scmp.ne.s32.totalorder %s3129_s23, 1 }
 0x16f   : > { %v738_v26 = vld [vmem:[#allocation9] sm:$0xff] (!%p2231_p11)  ;;  %v739_v27 = vld [vmem:[#allocation9 + $0x8] sm:$0xff] (!%p2231_p11)  ;;  %v740_v28 = vld [vmem:[#allocation9 + $0x10] sm:$0xff] (!%p2231_p11) }
 0x170   : > { %720 = sbr.rel (%p2231_p11) target bundleno = 628 (0x274), region = 92  ;;  %v2736_v29 = vpack.c.bf16 (!%p2231_p11), %v739_v27, %v738_v26  ;;  %v741_v30 = vld [vmem:[#allocation9 + $0x18] sm:$0xff] (!%p2231_p11)  ;;  %v742_v32 = vld [vmem:[#allocation9 + $0x20] sm:$0xff] (!%p2231_p11)  ;;  %v743_v33 = vld [vmem:[#allocation9 + $0x28] sm:$0xff] (!%p2231_p11) }
 0x171   : > { %v2740_v31 = vpack.c.bf16 (!%p2231_p11), %v741_v30, %v740_v28  ;;  %v2744_v34 = vpack.c.bf16 (!%p2231_p11), %v743_v33, %v742_v32  ;;  %v722_v35 = vld [vmem:[#allocation3] sm:$0xff] (!%p2231_p11)  ;;  %v744_v37 = vld [vmem:[#allocation9 + $0x30] sm:$0xff] (!%p2231_p11)  ;;  %v747_v41 = vld [vmem:[#allocation9 + $0x48] sm:$0xff] (!%p2231_p11) }
 0x172   : > { %2737 = vmatprep.subr.bf16.mxu0 (!%p2231_p11), %v2736_v29  ;;  %2872 = vmatprep.subr.bf16.mxu1 (!%p2231_p11), %v2736_v29  ;;  %v730_v36 = vld [vmem:[#allocation3 + $0x40] sm:$0xff] (!%p2231_p11)  ;;  %v748_v43 = vld [vmem:[#allocation9 + $0x50] sm:$0xff] (!%p2231_p11)  ;;  %v751_v47 = vld [vmem:[#allocation9 + $0x68] sm:$0xff] (!%p2231_p11) }
 0x173   : > { %2739 = vmatpush3.bf16.msra.mxu0 (!%p2231_p11), %v2736_v29  ;;  %2880 = vmatpush3.bf16.msra.mxu1 (!%p2231_p11), %v2736_v29  ;;  %v745_v38 = vld [vmem:[#allocation9 + $0x38] sm:$0xff] (!%p2231_p11)  ;;  %v746_v40 = vld [vmem:[#allocation9 + $0x40] sm:$0xff] (!%p2231_p11)  ;;  %v752_v49 = vld [vmem:[#allocation9 + $0x70] sm:$0xff] (!%p2231_p11) }
 0x174   : > { %2741 = vmatprep.subr.bf16.mxu0 (!%p2231_p11), %v2740_v31  ;;  %2873 = vmatprep.subr.bf16.mxu1 (!%p2231_p11), %v2740_v31  ;;  %v2748_v39 = vpack.c.bf16 (!%p2231_p11), %v745_v38, %v744_v37  ;;  %v2752_v42 = vpack.c.bf16 (!%p2231_p11), %v747_v41, %v746_v40  ;;  %v749_v44 = vld [vmem:[#allocation9 + $0x58] sm:$0xff] (!%p2231_p11)  ;;  %v750_v46 = vld [vmem:[#allocation9 + $0x60] sm:$0xff] (!%p2231_p11)  ;;  %v724_v54 = vld [vmem:[#allocation3 + $0x10] sm:$0xff] (!%p2231_p11) }
 0x175   : > { %2501 = vmatprep.mubr.f32.mxu0 (!%p2231_p11), %v722_v35  ;;  %2513 = vmatprep.mubr.f32.mxu1 (!%p2231_p11), %v730_v36  ;;  %v2756_v45 = vpack.c.bf16 (!%p2231_p11), %v749_v44, %v748_v43  ;;  %v2760_v48 = vpack.c.bf16 (!%p2231_p11), %v751_v47, %v750_v46  ;;  %v753_v50 = vld [vmem:[#allocation9 + $0x78] sm:$0xff] (!%p2231_p11)  ;;  %v723_v52 = vld [vmem:[#allocation3 + $0x8] sm:$0xff] (!%p2231_p11)  ;;  %v732_v55 = vld [vmem:[#allocation3 + $0x50] sm:$0xff] (!%p2231_p11) }
 0x176   : > { %v2764_v51 = vpack.c.bf16 (!%p2231_p11), %v753_v50, %v752_v49  ;;  %v731_v53 = vld [vmem:[#allocation3 + $0x48] sm:$0xff] (!%p2231_p11)  ;;  %v725_v56 = vld [vmem:[#allocation3 + $0x18] sm:$0xff] (!%p2231_p11)  ;;  %v726_v58 = vld [vmem:[#allocation3 + $0x20] sm:$0xff] (!%p2231_p11) }
 0x177   : > { %2743 = vmatpush3.bf16.msra.mxu0 %v2740_v31  ;;  %2881 = vmatpush3.bf16.msra.mxu1 %v2740_v31  ;;  %v733_v57 = vld [vmem:[#allocation3 + $0x58] sm:$0xff]  ;;  %v734_v59 = vld [vmem:[#allocation3 + $0x60] sm:$0xff]  ;;  %v727_v60 = vld [vmem:[#allocation3 + $0x28] sm:$0xff] }
 0x178   : > { %2745 = vmatprep.subr.bf16.mxu0 %v2744_v34  ;;  %2874 = vmatprep.subr.bf16.mxu1 %v2744_v34  ;;  %v735_v61 = vld [vmem:[#allocation3 + $0x68] sm:$0xff]  ;;  %v728_v62 = vld [vmem:[#allocation3 + $0x30] sm:$0xff]  ;;  %v729_v0 = vld [vmem:[#allocation3 + $0x38] sm:$0xff] }
 0x179   : > { %v736_v63 = vld [vmem:[#allocation3 + $0x70] sm:$0xff]  ;;  %v737_v1 = vld [vmem:[#allocation3 + $0x78] sm:$0xff] }
 0x17b   : > { %2747 = vmatpush3.bf16.msra.mxu0 %v2744_v34  ;;  %2882 = vmatpush3.bf16.msra.mxu1 %v2744_v34 }
 0x17c   : > { %2749 = vmatprep.subr.bf16.mxu0 %v2748_v39  ;;  %2875 = vmatprep.subr.bf16.mxu1 %v2748_v39 }
 0x17f   : > { %2751 = vmatpush3.bf16.msra.mxu0 %v2748_v39  ;;  %2883 = vmatpush3.bf16.msra.mxu1 %v2748_v39 }
 0x180   : > { %2753 = vmatprep.subr.bf16.mxu0 %v2752_v42  ;;  %2876 = vmatprep.subr.bf16.mxu1 %v2752_v42 }
 0x183   : > { %2755 = vmatpush3.bf16.msra.mxu0 %v2752_v42  ;;  %2884 = vmatpush3.bf16.msra.mxu1 %v2752_v42 }
 0x184   : > { %2757 = vmatprep.subr.bf16.mxu0 %v2756_v45  ;;  %2877 = vmatprep.subr.bf16.mxu1 %v2756_v45 }
 0x187   : > { %2759 = vmatpush3.bf16.msra.mxu0 %v2756_v45  ;;  %2885 = vmatpush3.bf16.msra.mxu1 %v2756_v45 }
 0x188   : > { %2761 = vmatprep.subr.bf16.mxu0 %v2760_v48  ;;  %2878 = vmatprep.subr.bf16.mxu1 %v2760_v48 }
 0x18b   : > { %2763 = vmatpush3.bf16.msra.mxu0 %v2760_v48  ;;  %2886 = vmatpush3.bf16.msra.mxu1 %v2760_v48 }
 0x18c   : > { %2765 = vmatprep.subr.bf16.mxu0 %v2764_v51  ;;  %2879 = vmatprep.subr.bf16.mxu1 %v2764_v51 }
 0x18f   : > { %2767 = vmatpush3.bf16.msra.mxu0 %v2764_v51  ;;  %2887 = vmatpush3.bf16.msra.mxu1 %v2764_v51 }
 0x192   : > { %2502 = vmatmul.mubr.f32.vlgmr.msra.gmra.mrb[0].mxu0 %v723_v52  ;;  %2514 = vmatmul.mubr.f32.vlgmr.msra.gmra.mrb[0].mxu1 %v731_v53 }
 0x193   : > { %2504 = vmatprep.mubr.f32.mxu0 %v724_v54  ;;  %2516 = vmatprep.mubr.f32.mxu1 %v732_v55 }
 0x196   : > { %2505 = vmatmul.mubr.f32.gmra.mrb[2].mxu0 %v725_v56  ;;  %2517 = vmatmul.mubr.f32.gmra.mrb[2].mxu1 %v733_v57 }
 0x197   : > { %2507 = vmatprep.mubr.f32.mxu0 %v726_v58  ;;  %2519 = vmatprep.mubr.f32.mxu1 %v734_v59 }
 0x19a   : > { %2508 = vmatmul.mubr.f32.gmra.mrb[4].mxu0 %v727_v60  ;;  %2520 = vmatmul.mubr.f32.gmra.mrb[4].mxu1 %v735_v61 }
 0x19b   : > { %2510 = vmatprep.mubr.f32.mxu0 %v728_v62  ;;  %2522 = vmatprep.mubr.f32.mxu1 %v736_v63 }
 0x19e   : > { %2511 = vmatmul.mubr.f32.gmra.mrb[6].mxu0 %v729_v0  ;;  %2523 = vmatmul.mubr.f32.gmra.mrb[6].mxu1 %v737_v1 }
 0x265   : > { %v2503_v18 = vpop.f32.mrb[0].mxu0  ;;  %v2515_v19 = vpop.f32.mrb[0].mxu1 }
 0x266   : > { %900 = vst [vmem:[#allocation4 + $0x8] sm:$0xff] %v2503_v18  ;;  %908 = vst [vmem:[#allocation4 + $0x48] sm:$0xff] %v2515_v19  ;;  %v820_v20 = vpop.f32.mrb[1].mxu0  ;;  %v860_v21 = vpop.f32.mrb[1].mxu1 }
 0x267   : > { %899 = vst [vmem:[#allocation4] sm:$0xff] %v820_v20  ;;  %907 = vst [vmem:[#allocation4 + $0x40] sm:$0xff] %v860_v21 }
 0x269   : > { %v2506_v22 = vpop.f32.mrb[2].mxu0  ;;  %v2518_v23 = vpop.f32.mrb[2].mxu1 }
 0x26a   : > { %902 = vst [vmem:[#allocation4 + $0x18] sm:$0xff] %v2506_v22  ;;  %910 = vst [vmem:[#allocation4 + $0x58] sm:$0xff] %v2518_v23  ;;  %v830_v24 = vpop.f32.mrb[3].mxu0  ;;  %v870_v25 = vpop.f32.mrb[3].mxu1 }
 0x26b   : > { %901 = vst [vmem:[#allocation4 + $0x10] sm:$0xff] %v830_v24  ;;  %909 = vst [vmem:[#allocation4 + $0x50] sm:$0xff] %v870_v25 }
 0x26d   : > { %v2509_v26 = vpop.f32.mrb[4].mxu0  ;;  %v2521_v27 = vpop.f32.mrb[4].mxu1 }
 0x26e   : > { %904 = vst [vmem:[#allocation4 + $0x28] sm:$0xff] %v2509_v26  ;;  %912 = vst [vmem:[#allocation4 + $0x68] sm:$0xff] %v2521_v27  ;;  %v840_v28 = vpop.f32.mrb[5].mxu0  ;;  %v880_v29 = vpop.f32.mrb[5].mxu1 }
 0x26f   : > { %903 = vst [vmem:[#allocation4 + $0x20] sm:$0xff] %v840_v28  ;;  %911 = vst [vmem:[#allocation4 + $0x60] sm:$0xff] %v880_v29 }
 0x271   : > { %v2512_v30 = vpop.f32.mrb[6].mxu0  ;;  %v2524_v31 = vpop.f32.mrb[6].mxu1 }
 0x272   : > { %906 = vst [vmem:[#allocation4 + $0x38] sm:$0xff] %v2512_v30  ;;  %914 = vst [vmem:[#allocation4 + $0x78] sm:$0xff] %v2524_v31  ;;  %v850_v32 = vpop.f32.mrb[7].mxu0  ;;  %v890_v33 = vpop.f32.mrb[7].mxu1 }
 0x273   : > { %905 = vst [vmem:[#allocation4 + $0x30] sm:$0xff] %v850_v32  ;;  %913 = vst [vmem:[#allocation4 + $0x70] sm:$0xff] %v890_v33 }
 0x274 PF: > { %v3147_v34 = vmov 0   ;;  %v924_v48 = vld [vmem:[#allocation4 + $0x48] sm:$0xff]  ;;  %v923_v49 = vld [vmem:[#allocation4 + $0x40] sm:$0xff]  ;;  %v926_v55 = vld [vmem:[#allocation4 + $0x58] sm:$0xff] }
 0x275   : > { %2980 = vset.pattern.permute.xlu1 %v3147_v34  ;;  %2979 = vset.pattern.permute.xlu0 %v3147_v34  ;;  %v920_v35 = vld [vmem:[#allocation4 + $0x28] sm:$0xff]  ;;  %v925_v56 = vld [vmem:[#allocation4 + $0x50] sm:$0xff]  ;;  %v2987_v33 = vld [vmem:[#allocation6 + $0x18] sm:$0xff]  }
 0x276   : > { %943 = vperm.xlu1 %2980, %v3366_v4   ;;  %933 = vperm.xlu0 %2979, %v3356_v2   ;;  %v2981_v2 = vld [vmem:[#allocation6] sm:$0xff]   ;;  %v2983_v29 = vld [vmem:[#allocation6 + $0x8] sm:$0xff]   ;;  %v2985_v31 = vld [vmem:[#allocation6 + $0x10] sm:$0xff]  }
 0x277   : > { %2541 = vmatprep.mubr.bf16.mxu0 %v2981_v2  ;;  %v928_v62 = vld [vmem:[#allocation4 + $0x68] sm:$0xff]  ;;  %v927_v63 = vld [vmem:[#allocation4 + $0x60] sm:$0xff]  ;;  %v2986_v32 = vld [vmem:[#allocation6 + $0x30] sm:$0xff]  }
 0x278   : > { %v2984_v30 = vld [vmem:[#allocation6 + $0x28] sm:$0xff]   ;;  %v2988_v34 = vld [vmem:[#allocation6 + $0x38] sm:$0xff]  }
 0x279   : > { %v922_v41 = vld [vmem:[#allocation4 + $0x38] sm:$0xff]  ;;  %v1037_v2 = vld [vmem:[#allocation2 + $0x10] sm:$0xff] }
 0x27a   : > { %948 = vperm.xlu1 %2980, %v3371_v5   ;;  %938 = vperm.xlu0 %2979, %v3361_v3   ;;  %v2982_v3 = vld [vmem:[#allocation6 + $0x20] sm:$0xff]   ;;  %v921_v42 = vld [vmem:[#allocation4 + $0x30] sm:$0xff]  ;;  %v930_v21 = vld [vmem:[#allocation4 + $0x78] sm:$0xff] }
 0x27b   : > { %2549 = vmatprep.mubr.bf16.mxu1 %v2982_v3  ;;  %v929_v22 = vld [vmem:[#allocation4 + $0x70] sm:$0xff] }
 0x27c   : > { %v1045_v3 = vld [vmem:[#allocation2 + $0x50] sm:$0xff] }
 0x27e   : > { %958 = vperm.xlu1 %2980, %v3381_v7   ;;  %953 = vperm.xlu0 %2979, %v3376_v6   ;;  %v917_v6 = vld [vmem:[#allocation4 + $0x10] sm:$0xff]  ;;  %v915_v7 = vld [vmem:[#allocation4] sm:$0xff] }
 0x282   : > { %968 = vperm.xlu1 %2980, %v3391_v9   ;;  %963 = vperm.xlu0 %2979, %v3386_v8   ;;  %v918_v8 = vld [vmem:[#allocation4 + $0x18] sm:$0xff]  ;;  %v916_v9 = vld [vmem:[#allocation4 + $0x8] sm:$0xff] }
 0x286   : > { %978 = vperm.xlu1 %2980, %v3401_v11   ;;  %973 = vperm.xlu0 %2979, %v3396_v10  }
 0x28a   : > { %988 = vperm.xlu1 %2980, %v3411_v13   ;;  %983 = vperm.xlu0 %2979, %v3406_v12  }
 0x28e   : > { %998 = vperm.xlu1 %2980, %v3421_v15   ;;  %993 = vperm.xlu0 %2979, %v3416_v14  }
 0x292   : > { %1008 = vperm.xlu1 %2980, %v3431_v17   ;;  %1003 = vperm.xlu0 %2979, %v3426_v16   ;;  %v919_v17 = vld [vmem:[#allocation4 + $0x20] sm:$0xff] }
 0x2f5   : > { %v944_v4 = vpop.permute.xlu1 %943  ;;  %v934_v5 = vpop.permute.xlu0 %933 }
 0x2f6   : > { %v1013_v12 = vmul.f32 %v944_v4, %v917_v6  ;;  %v1011_v13 = vmul.f32 %v934_v5, %v915_v7  ;;  %v1035_v4 = vld [vmem:[#allocation2] sm:$0xff] }
 0x2f7   : > { %v1043_v5 = vld [vmem:[#allocation2 + $0x40] sm:$0xff] }
 0x2f9   : > { %v949_v10 = vpop.permute.xlu1 %948  ;;  %v939_v11 = vpop.permute.xlu0 %938 }
 0x2fa   : > { %v1014_v15 = vmul.f32 %v949_v10, %v918_v8  ;;  %v1012_v14 = vmul.f32 %v939_v11, %v916_v9  ;;  %v1038_v8 = vld [vmem:[#allocation2 + $0x18] sm:$0xff] }
 0x2fb   : > { %v1046_v9 = vld [vmem:[#allocation2 + $0x58] sm:$0xff] }
 0x2fc   : > { %v1027_v36 = vpack.c.bf16 %v1012_v14, %v1011_v13  ;;  %v1028_v38 = vpack.c.bf16 %v1014_v15, %v1013_v12  ;;  %v1036_v15 = vld [vmem:[#allocation2 + $0x8] sm:$0xff] }
 0x2fd   : > { %v959_v16 = vpop.permute.xlu1 %958  ;;  %v954_v37 = vpop.permute.xlu0 %953  ;;  %v1044_v14 = vld [vmem:[#allocation2 + $0x48] sm:$0xff] }
 0x2fe   : > { %v1016_v39 = vmul.f32 %v959_v16, %v920_v35  ;;  %v1015_v40 = vmul.f32 %v954_v37, %v919_v17  ;;  %2525 = vmatprep.subr.bf16.mxu0 %v1027_v36  ;;  %2888 = vmatprep.subr.bf16.mxu1 %v1027_v36 }
 0x2ff   : > { %2526 = vmatpush3.bf16.msra.mxu0 %v1027_v36  ;;  %2896 = vmatpush3.bf16.msra.mxu1 %v1027_v36 }
 0x300   : > { %2527 = vmatprep.subr.bf16.mxu0 %v1028_v38  ;;  %2889 = vmatprep.subr.bf16.mxu1 %v1028_v38  ;;  %v1029_v45 = vpack.c.bf16 %v1016_v39, %v1015_v40 }
 0x301   : > { %v969_v43 = vpop.permute.xlu1 %968  ;;  %v964_v44 = vpop.permute.xlu0 %963 }
 0x302   : > { %v1018_v46 = vmul.f32 %v969_v43, %v922_v41  ;;  %v1017_v47 = vmul.f32 %v964_v44, %v921_v42  ;;  %v1041_v43 = vld [vmem:[#allocation2 + $0x30] sm:$0xff] }
 0x303   : > { %2528 = vmatpush3.bf16.msra.mxu0 %v1028_v38  ;;  %2897 = vmatpush3.bf16.msra.mxu1 %v1028_v38  ;;  %v1049_v44 = vld [vmem:[#allocation2 + $0x70] sm:$0xff] }
 0x304   : > { %2529 = vmatprep.subr.bf16.mxu0 %v1029_v45  ;;  %2890 = vmatprep.subr.bf16.mxu1 %v1029_v45  ;;  %v1030_v52 = vpack.c.bf16 %v1018_v46, %v1017_v47  ;;  %v1047_v46 = vld [vmem:[#allocation2 + $0x60] sm:$0xff] }
 0x305   : > { %v979_v50 = vpop.permute.xlu1 %978  ;;  %v974_v51 = vpop.permute.xlu0 %973 }
 0x306   : > { %v1020_v53 = vmul.f32 %v979_v50, %v924_v48  ;;  %v1019_v54 = vmul.f32 %v974_v51, %v923_v49  ;;  %v1042_v49 = vld [vmem:[#allocation2 + $0x38] sm:$0xff] }
 0x307   : > { %2530 = vmatpush3.bf16.msra.mxu0 %v1029_v45  ;;  %2898 = vmatpush3.bf16.msra.mxu1 %v1029_v45  ;;  %v1039_v45 = vld [vmem:[#allocation2 + $0x20] sm:$0xff]  ;;  %v1050_v50 = vld [vmem:[#allocation2 + $0x78] sm:$0xff] }
 0x308   : > { %2531 = vmatprep.subr.bf16.mxu0 %v1030_v52  ;;  %2891 = vmatprep.subr.bf16.mxu1 %v1030_v52  ;;  %v1031_v59 = vpack.c.bf16 %v1020_v53, %v1019_v54 }
 0x309   : > { %v989_v57 = vpop.permute.xlu1 %988  ;;  %v984_v58 = vpop.permute.xlu0 %983 }
 0x30a   : > { %v1022_v60 = vmul.f32 %v989_v57, %v926_v55  ;;  %v1021_v61 = vmul.f32 %v984_v58, %v925_v56  ;;  %v1040_v55 = vld [vmem:[#allocation2 + $0x28] sm:$0xff] }
 0x30b   : > { %2532 = vmatpush3.bf16.msra.mxu0 %v1030_v52  ;;  %2899 = vmatpush3.bf16.msra.mxu1 %v1030_v52  ;;  %v1048_v56 = vld [vmem:[#allocation2 + $0x68] sm:$0xff] }
 0x30c   : > { %2533 = vmatprep.subr.bf16.mxu0 %v1031_v59  ;;  %2892 = vmatprep.subr.bf16.mxu1 %v1031_v59  ;;  %v1032_v18 = vpack.c.bf16 %v1022_v60, %v1021_v61 }
 0x30d   : > { %v999_v0 = vpop.permute.xlu1 %998  ;;  %v994_v1 = vpop.permute.xlu0 %993 }
 0x30e   : > { %v1024_v19 = vmul.f32 %v999_v0, %v928_v62  ;;  %v1023_v20 = vmul.f32 %v994_v1, %v927_v63 }
 0x30f   : > { %2534 = vmatpush3.bf16.msra.mxu0 %v1031_v59  ;;  %2900 = vmatpush3.bf16.msra.mxu1 %v1031_v59 }
 0x310   : > { %2535 = vmatprep.subr.bf16.mxu0 %v1032_v18  ;;  %2893 = vmatprep.subr.bf16.mxu1 %v1032_v18  ;;  %v1033_v25 = vpack.c.bf16 %v1024_v19, %v1023_v20  ;;  %v1250_v19 = vld [vmem:[%s3790_s1 + $0x10] sm:$0xff] (%p520_p2)  ;;  %v1248_v20 = vld [vmem:[%s3790_s1] sm:$0xff] (%p520_p2) }
 0x311   : > { %v1009_v23 = vpop.permute.xlu1 %1008  ;;  %v1004_v24 = vpop.permute.xlu0 %1003 }
 0x312   : > { %v1026_v26 = vmul.f32 %v1009_v23, %v930_v21  ;;  %v1025_v27 = vmul.f32 %v1004_v24, %v929_v22  ;;  %v3148_v21 = vmov (%p520_p2), 0   ;;  %v1251_v22 = vld [vmem:[%s3790_s1 + $0x18] sm:$0xff] (%p520_p2)  ;;  %v1249_v23 = vld [vmem:[%s3790_s1 + $0x8] sm:$0xff] (%p520_p2) }
 0x313   : > { %2536 = vmatpush3.bf16.msra.mxu0 %v1032_v18  ;;  %2901 = vmatpush3.bf16.msra.mxu1 %v1032_v18  ;;  %v1253_v24 = vld [vmem:[%s3790_s1 + $0x28] sm:$0xff] (%p520_p2) }
 0x314   : > { %2537 = vmatprep.subr.bf16.mxu0 %v1033_v25  ;;  %2894 = vmatprep.subr.bf16.mxu1 %v1033_v25  ;;  %v1034_v28 = vpack.c.bf16 %v1026_v26, %v1025_v27  ;;  %v1255_v26 = vld [vmem:[%s3790_s1 + $0x38] sm:$0xff] (%p520_p2)  ;;  %v1254_v27 = vld [vmem:[%s3790_s1 + $0x30] sm:$0xff] (%p520_p2) }
 0x315   : > { %2990 = vset.pattern.permute.xlu1 (%p520_p2), %v3148_v21  ;;  %2989 = vset.pattern.permute.xlu0 (%p520_p2), %v3148_v21 }
 0x316   : > { %1292 = vperm.xlu1 (%p520_p2), %2990, %v1250_v19   ;;  %1282 = vperm.xlu0 (%p520_p2), %2989, %v1248_v20  }
 0x317   : > { %2538 = vmatpush3.bf16.msra.mxu0 %v1033_v25  ;;  %2902 = vmatpush3.bf16.msra.mxu1 %v1033_v25  ;;  %v1252_v25 = vld [vmem:[%s3790_s1 + $0x20] sm:$0xff] (%p520_p2) }
 0x318   : > { %2539 = vmatprep.subr.bf16.mxu0 %v1034_v28  ;;  %2895 = vmatprep.subr.bf16.mxu1 %v1034_v28 }
 0x31a   : > { %1297 = vperm.xlu1 (%p520_p2), %2990, %v1251_v22   ;;  %1287 = vperm.xlu0 (%p520_p2), %2989, %v1249_v23  }
 0x31b   : > { %2540 = vmatpush3.bf16.msra.mxu0 %v1034_v28  ;;  %2903 = vmatpush3.bf16.msra.mxu1 %v1034_v28  ;;  %v1257_v28 = vld [vmem:[%s3790_s1 + $0x48] sm:$0xff] (%p520_p2) }
 0x31e   : > { %2542 = vmatmul.mubr.bf16.vlgmr.msra.gmra.mrb[0].mxu0 %v2983_v29  ;;  %2550 = vmatmul.mubr.bf16.vlgmr.msra.gmra.mrb[0].mxu1 %v2984_v30  ;;  %v1256_v29 = vld [vmem:[%s3790_s1 + $0x40] sm:$0xff] (%p520_p2)  ;;  %v1259_v30 = vld [vmem:[%s3790_s1 + $0x58] sm:$0xff] (%p520_p2) }
 0x31f   : > { %2545 = vmatprep.mubr.bf16.mxu0 %v2985_v31  ;;  %2553 = vmatprep.mubr.bf16.mxu1 %v2986_v32  ;;  %v1258_v31 = vld [vmem:[%s3790_s1 + $0x50] sm:$0xff] (%p520_p2)  ;;  %v1261_v32 = vld [vmem:[%s3790_s1 + $0x68] sm:$0xff] (%p520_p2) }
 0x320   : > { %1307 = vperm.xlu1 (%p520_p2), %2990, %v1253_v24   ;;  %1302 = vperm.xlu0 (%p520_p2), %2989, %v1252_v25  }
 0x324   : > { %1317 = vperm.xlu1 (%p520_p2), %2990, %v1255_v26   ;;  %1312 = vperm.xlu0 (%p520_p2), %2989, %v1254_v27  }
 0x326   : > { %2546 = vmatmul.mubr.bf16.gmra.mrb[4].mxu0 %v2987_v33  ;;  %2554 = vmatmul.mubr.bf16.gmra.mrb[4].mxu1 %v2988_v34  ;;  %v1260_v33 = vld [vmem:[%s3790_s1 + $0x60] sm:$0xff] (%p520_p2)  ;;  %v1263_v34 = vld [vmem:[%s3790_s1 + $0x78] sm:$0xff] (%p520_p2) }
 0x328   : > { %1327 = vperm.xlu1 (%p520_p2), %2990, %v1257_v28   ;;  %1322 = vperm.xlu0 (%p520_p2), %2989, %v1256_v29  }
 0x32c   : > { %1337 = vperm.xlu1 (%p520_p2), %2990, %v1259_v30   ;;  %1332 = vperm.xlu0 (%p520_p2), %2989, %v1258_v31  }
 0x330   : > { %1347 = vperm.xlu1 (%p520_p2), %2990, %v1261_v32   ;;  %1342 = vperm.xlu0 (%p520_p2), %2989, %v1260_v33  }
 0x334   : > { %1357 = vperm.xlu1 (%p520_p2), %2990, %v1263_v34  }
 0x3f1   : > { %v2543_v6 = vpop.f32.mrb[0].mxu0  ;;  %v2551_v7 = vpop.f32.mrb[0].mxu1 }
 0x3f2   : > { %v1214_v10 = vadd.f32 %v2543_v6, %v1037_v2  ;;  %v1222_v11 = vadd.f32 %v2551_v7, %v1045_v3  ;;  %v1149_v12 = vpop.f32.mrb[1].mxu0  ;;  %v1181_v13 = vpop.f32.mrb[1].mxu1  ;;  %v1262_v2 = vld [vmem:[%s3790_s1 + $0x70] sm:$0xff] (%p520_p2) }
 0x3f3   : > { %v1212_v35 = vadd.f32 %v1149_v12, %v1035_v4  ;;  %v1220_v17 = vadd.f32 %v1181_v13, %v1043_v5  ;;  %v2544_v36 = vpop.f32.mrb[2].mxu0  ;;  %v2552_v16 = vpop.f32.mrb[2].mxu1  ;;  %1352 = vperm.xlu0 (%p520_p2), %2989, %v1262_v2   ;;  %v3601_v5 = vld [vmem:[%s3793_s4] ss:$0 sm:$0xff] (%p520_p2) }
 0x3f4   : > { %1230 = vst [vmem:[#allocation2 + $0x10] sm:$0xff] %v1214_v10  ;;  %1238 = vst [vmem:[#allocation2 + $0x50] sm:$0xff] %v1222_v11  ;;  %v1215_v37 = vadd.f32 %v2544_v36, %v1038_v8  ;;  %v1223_v38 = vadd.f32 %v2552_v16, %v1046_v9  ;;  %v1152_v39 = vpop.f32.mrb[3].mxu0  ;;  %v1184_v40 = vpop.f32.mrb[3].mxu1 }
 0x3f5   : > { %1228 = vst [vmem:[#allocation2] sm:$0xff] %v1212_v35  ;;  %1236 = vst [vmem:[#allocation2 + $0x40] sm:$0xff] %v1220_v17  ;;  %v1213_v41 = vadd.f32 %v1152_v39, %v1036_v15  ;;  %v1221_v42 = vadd.f32 %v1184_v40, %v1044_v14  ;;  %v1293_v6 = vpop.permute.xlu1 (%p520_p2), %1292  ;;  %v1283_v7 = vpop.permute.xlu0 (%p520_p2), %1282 }
 0x3f6   : > { %1231 = vst [vmem:[#allocation2 + $0x18] sm:$0xff] %v1215_v37  ;;  %1239 = vst [vmem:[#allocation2 + $0x58] sm:$0xff] %v1223_v38 }
 0x3f7   : > { %1229 = vst [vmem:[#allocation2 + $0x8] sm:$0xff] %v1213_v41  ;;  %1237 = vst [vmem:[#allocation2 + $0x48] sm:$0xff] %v1221_v42 }
 0x3f9   : > { %v2547_v47 = vpop.f32.mrb[4].mxu0  ;;  %v2555_v48 = vpop.f32.mrb[4].mxu1  ;;  %1247 = sbr.rel (!%p520_p2) target bundleno = 1146 (0x47a), region = 96 }
 0x3fa   : > { %v1218_v51 = vadd.f32 %v2547_v47, %v1041_v43  ;;  %v1226_v52 = vadd.f32 %v2555_v48, %v1049_v44  ;;  %v1165_v53 = vpop.f32.mrb[5].mxu0  ;;  %v1197_v54 = vpop.f32.mrb[5].mxu1 }
 0x3fb   : > { %v1216_v57 = vadd.f32 %v1165_v53, %v1039_v45  ;;  %v1224_v58 = vadd.f32 %v1197_v54, %v1047_v46  ;;  %v2548_v59 = vpop.f32.mrb[6].mxu0  ;;  %v2556_v60 = vpop.f32.mrb[6].mxu1  ;;  %v1266_v3 = vld [vmem:[#allocation2 + $0x10] sm:$0xff] (%p520_p2) }
 0x3fc   : > { %1234 = vst [vmem:[#allocation2 + $0x30] sm:$0xff] %v1218_v51  ;;  %1242 = vst [vmem:[#allocation2 + $0x70] sm:$0xff] %v1226_v52  ;;  %v1219_v61 = vadd.f32 %v2548_v59, %v1042_v49  ;;  %v1227_v62 = vadd.f32 %v2556_v60, %v1050_v50  ;;  %v1168_v63 = vpop.f32.mrb[7].mxu0  ;;  %v1200_v0 = vpop.f32.mrb[7].mxu1  ;;  %v1264_v4 = vld [vmem:[#allocation2] sm:$0xff] (%p520_p2)  ;;  %v1362_v8 = vmul.f32 (%p520_p2), %v1293_v6, %v1266_v3  ;;  %v1274_v20 = vld [vmem:[#allocation2 + $0x50] sm:$0xff] (%p520_p2) }
 0x3fd   : > { %1232 = vst [vmem:[#allocation2 + $0x20] sm:$0xff] %v1216_v57  ;;  %1240 = vst [vmem:[#allocation2 + $0x60] sm:$0xff] %v1224_v58  ;;  %v1217_v1 = vadd.f32 %v1168_v63, %v1040_v55  ;;  %v1225_v18 = vadd.f32 %v1200_v0, %v1048_v56  ;;  %v1360_v9 = vmul.f32 (%p520_p2), %v1283_v7, %v1264_v4  ;;  %v1267_v10 = vld [vmem:[#allocation2 + $0x18] sm:$0xff] (%p520_p2)  ;;  %v1298_v15 = vpop.permute.xlu1 (%p520_p2), %1297  ;;  %v1288_v14 = vpop.permute.xlu0 (%p520_p2), %1287  ;;  %v1272_v58 = vld [vmem:[#allocation2 + $0x40] sm:$0xff] (%p520_p2) }
 0x3fe   : > { %1235 = vst [vmem:[#allocation2 + $0x38] sm:$0xff] %v1219_v61  ;;  %1243 = vst [vmem:[#allocation2 + $0x78] sm:$0xff] %v1227_v62  ;;  %v1265_v11 = vld [vmem:[#allocation2 + $0x8] sm:$0xff] (%p520_p2)  ;;  %v1385_v12 = vadd.f32 (%p520_p2), %v3601_v5, %v1362_v8  ;;  %v1363_v36 = vmul.f32 (%p520_p2), %v1298_v15, %v1267_v10  ;;  %v1275_v19 = vld [vmem:[#allocation2 + $0x58] sm:$0xff] (%p520_p2) }
 0x3ff   : > { %1233 = vst [vmem:[#allocation2 + $0x28] sm:$0xff] %v1217_v1  ;;  %1241 = vst [vmem:[#allocation2 + $0x68] sm:$0xff] %v1225_v18  ;;  %v1383_v13 = vadd.f32 (%p520_p2), %v3601_v5, %v1360_v9  ;;  %v1361_v16 = vmul.f32 (%p520_p2), %v1288_v14, %v1265_v11  ;;  %v1273_v57 = vld [vmem:[#allocation2 + $0x48] sm:$0xff] (%p520_p2) }
 0x400   : > { %v1401_v35 = vmax.f32 %v1385_v12, 0.0  ;;  %v1386_v39 = vadd.f32 %v3601_v5, %v1363_v36 }
 0x401   : > { %v1399_v17 = vmax.f32 %v1383_v13, 0.0  ;;  %v1384_v40 = vadd.f32 %v3601_v5, %v1361_v16  ;;  %v1308_v41 = vpop.permute.xlu1 %1307  ;;  %v1303_v42 = vpop.permute.xlu0 %1302 }
 0x402   : > { %1417 = vst [vmem:[#allocation3 + $0x10] sm:$0xff] %v1401_v35  ;;  %v1402_v43 = vmax.f32 %v1386_v39, 0.0 }
 0x403   : > { %1415 = vst [vmem:[#allocation3] sm:$0xff] %v1399_v17  ;;  %v1400_v44 = vmax.f32 %v1384_v40, 0.0  ;;  %v1270_v48 = vld [vmem:[#allocation2 + $0x30] sm:$0xff] }
 0x404   : > { %v1268_v38 = vld [vmem:[#allocation2 + $0x20] sm:$0xff]  ;;  %1418 = vst [vmem:[#allocation3 + $0x18] sm:$0xff] %v1402_v43  ;;  %v1278_v8 = vld [vmem:[#allocation2 + $0x70] sm:$0xff] }
 0x405   : > { %v1364_v46 = vmul.f32 %v1303_v42, %v1268_v38  ;;  %v1271_v47 = vld [vmem:[#allocation2 + $0x38] sm:$0xff]  ;;  %1416 = vst [vmem:[#allocation3 + $0x8] sm:$0xff] %v1400_v44  ;;  %v1318_v51 = vpop.permute.xlu1 %1317  ;;  %v1313_v52 = vpop.permute.xlu0 %1312  ;;  %v1276_v30 = vld [vmem:[#allocation2 + $0x60] sm:$0xff] }
 0x406   : > { %v1269_v37 = vld [vmem:[#allocation2 + $0x28] sm:$0xff]  ;;  %v1367_v55 = vmul.f32 %v1318_v51, %v1271_v47  ;;  %v1366_v56 = vmul.f32 %v1313_v52, %v1270_v48  ;;  %v1279_v7 = vld [vmem:[#allocation2 + $0x78] sm:$0xff] }
 0x407   : > { %v1365_v45 = vmul.f32 %v1308_v41, %v1269_v37  ;;  %v1387_v50 = vadd.f32 %v3601_v5, %v1364_v46  ;;  %v1277_v29 = vld [vmem:[#allocation2 + $0x68] sm:$0xff] }
 0x408   : > { %v1390_v59 = vadd.f32 %v3601_v5, %v1367_v55  ;;  %v1389_v60 = vadd.f32 %v3601_v5, %v1366_v56 }
 0x409   : > { %v1388_v49 = vadd.f32 %v3601_v5, %v1365_v45  ;;  %v1403_v54 = vmax.f32 %v1387_v50, 0.0  ;;  %v1328_v61 = vpop.permute.xlu1 %1327  ;;  %v1323_v62 = vpop.permute.xlu0 %1322 }
 0x40a   : > { %v1406_v63 = vmax.f32 %v1390_v59, 0.0  ;;  %v1405_v0 = vmax.f32 %v1389_v60, 0.0  ;;  %v1369_v1 = vmul.f32 %v1328_v61, %v1273_v57  ;;  %v1368_v18 = vmul.f32 %v1323_v62, %v1272_v58 }
 0x40b   : > { %v1404_v53 = vmax.f32 %v1388_v49, 0.0  ;;  %1419 = vst [vmem:[#allocation3 + $0x20] sm:$0xff] %v1403_v54 }
 0x40c   : > { %1422 = vst [vmem:[#allocation3 + $0x38] sm:$0xff] %v1406_v63  ;;  %1421 = vst [vmem:[#allocation3 + $0x30] sm:$0xff] %v1405_v0  ;;  %v1392_v21 = vadd.f32 %v3601_v5, %v1369_v1  ;;  %v1391_v22 = vadd.f32 %v3601_v5, %v1368_v18 }
 0x40d   : > { %1420 = vst [vmem:[#allocation3 + $0x28] sm:$0xff] %v1404_v53  ;;  %v1338_v23 = vpop.permute.xlu1 %1337  ;;  %v1333_v24 = vpop.permute.xlu0 %1332 }
 0x40e   : > { %v1408_v25 = vmax.f32 %v1392_v21, 0.0  ;;  %v1407_v26 = vmax.f32 %v1391_v22, 0.0  ;;  %v1371_v27 = vmul.f32 %v1338_v23, %v1275_v19  ;;  %v1370_v28 = vmul.f32 %v1333_v24, %v1274_v20 }
 0x410   : > { %1424 = vst [vmem:[#allocation3 + $0x48] sm:$0xff] %v1408_v25  ;;  %1423 = vst [vmem:[#allocation3 + $0x40] sm:$0xff] %v1407_v26  ;;  %v1394_v31 = vadd.f32 %v3601_v5, %v1371_v27  ;;  %v1393_v32 = vadd.f32 %v3601_v5, %v1370_v28 }
 0x411   : > { %v1348_v33 = vpop.permute.xlu1 %1347  ;;  %v1343_v34 = vpop.permute.xlu0 %1342 }
 0x412   : > { %v1410_v2 = vmax.f32 %v1394_v31, 0.0  ;;  %v1409_v3 = vmax.f32 %v1393_v32, 0.0  ;;  %v1373_v4 = vmul.f32 %v1348_v33, %v1277_v29  ;;  %v1372_v6 = vmul.f32 %v1343_v34, %v1276_v30 }
 0x414   : > { %1426 = vst [vmem:[#allocation3 + $0x58] sm:$0xff] %v1410_v2  ;;  %1425 = vst [vmem:[#allocation3 + $0x50] sm:$0xff] %v1409_v3  ;;  %v1396_v9 = vadd.f32 %v3601_v5, %v1373_v4  ;;  %v1395_v10 = vadd.f32 %v3601_v5, %v1372_v6 }
 0x415   : > { %v1358_v11 = vpop.permute.xlu1 %1357 }
 0x416   : > { %v1412_v13 = vmax.f32 %v1396_v9, 0.0  ;;  %v1411_v15 = vmax.f32 %v1395_v10, 0.0  ;;  %v1375_v14 = vmul.f32 %v1358_v11, %v1279_v7 }
 0x418   : > { %1428 = vst [vmem:[#allocation3 + $0x68] sm:$0xff] %v1412_v13  ;;  %1427 = vst [vmem:[#allocation3 + $0x60] sm:$0xff] %v1411_v15  ;;  %v1398_v17 = vadd.f32 %v3601_v5, %v1375_v14 }
 0x41a   : > { %v1414_v16 = vmax.f32 %v1398_v17, 0.0 }
 0x41c   : > { %1430 = vst [vmem:[#allocation3 + $0x78] sm:$0xff] %v1414_v16 }
 0x472   : > { %v1353_v12 = vpop.permute.xlu0 %1352 }
 0x473   : > { %v1374_v35 = vmul.f32 %v1353_v12, %v1278_v8 }
 0x475   : > { %v1397_v36 = vadd.f32 %v3601_v5, %v1374_v35 }
 0x477   : > { %v1413_v37 = vmax.f32 %v1397_v36, 0.0 }
 0x479   : > { %1429 = vst [vmem:[#allocation3 + $0x70] sm:$0xff] %v1413_v37 }
 0x47a PF: > { %1434 = sbr.rel (!%p717_p10) target bundleno = 1876 (0x754), region = 100  ;;  %v1437_v38 = vld [vmem:[%s3790_s1 + $0x10] sm:$0xff] (%p717_p10)  ;;  %v1435_v39 = vld [vmem:[%s3790_s1] sm:$0xff] (%p717_p10)  ;;  %v3149_v40 = vmov (%p717_p10), 0   ;;  %v1438_v5 = vld [vmem:[%s3790_s1 + $0x18] sm:$0xff] (%p717_p10)  ;;  %vm3151_vm0 = vmmov (%p717_p10), 0  }
 0x47b   : > { %2992 = vset.pattern.permute.xlu1 (%p717_p10), %v3149_v40  ;;  %2991 = vset.pattern.permute.xlu0 (%p717_p10), %v3149_v40  ;;  %v1436_v41 = vld [vmem:[%s3790_s1 + $0x8] sm:$0xff] (%p717_p10)  ;;  %v1604_v45 = vld [vmem:[#allocation11 + $0x10] sm:$0xff] (%p717_p10)  ;;  %v1605_v46 = vld [vmem:[#allocation11 + $0x18] sm:$0xff] (%p717_p10) }
 0x47c   : > { %1479 = vperm.xlu1 (%p717_p10), %2992, %v1437_v38   ;;  %1469 = vperm.xlu0 (%p717_p10), %2991, %v1435_v39   ;;  %v1602_v42 = vld [vmem:[#allocation11] sm:$0xff] (%p717_p10)  ;;  %v1603_v43 = vld [vmem:[#allocation11 + $0x8] sm:$0xff] (%p717_p10)  ;;  %v2772_v49 = vpack.c.bf16 (%p717_p10), %v1605_v46, %v1604_v45  ;;  %v1442_v52 = vld [vmem:[%s3790_s1 + $0x38] sm:$0xff] (%p717_p10) }
 0x47d   : > { %v2768_v44 = vpack.c.bf16 (%p717_p10), %v1603_v43, %v1602_v42  ;;  %v1440_v47 = vld [vmem:[%s3790_s1 + $0x28] sm:$0xff] (%p717_p10)  ;;  %v1439_v48 = vld [vmem:[%s3790_s1 + $0x20] sm:$0xff] (%p717_p10)  ;;  %v1441_v53 = vld [vmem:[%s3790_s1 + $0x30] sm:$0xff] (%p717_p10) }
 0x47e   : > { %v1606_v50 = vld [vmem:[#allocation11 + $0x20] sm:$0xff] (%p717_p10)  ;;  %v1607_v51 = vld [vmem:[#allocation11 + $0x28] sm:$0xff] (%p717_p10)  ;;  %v1608_v55 = vld [vmem:[#allocation11 + $0x30] sm:$0xff] (%p717_p10) }
 0x47f   : > { %2769 = vmatprep.subr.bf16.mxu1 (%p717_p10), %v2768_v44  ;;  %v2776_v54 = vpack.c.bf16 (%p717_p10), %v1607_v51, %v1606_v50  ;;  %v1609_v56 = vld [vmem:[#allocation11 + $0x38] sm:$0xff] (%p717_p10)  ;;  %v1444_v57 = vld [vmem:[%s3790_s1 + $0x48] sm:$0xff] (%p717_p10)  ;;  %v1445_v63 = vld [vmem:[%s3790_s1 + $0x50] sm:$0xff] (%p717_p10) }
 0x480   : > { %1484 = vperm.xlu1 (%p717_p10), %2992, %v1438_v5   ;;  %1474 = vperm.xlu0 (%p717_p10), %2991, %v1436_v41   ;;  %v1443_v58 = vld [vmem:[%s3790_s1 + $0x40] sm:$0xff] (%p717_p10)  ;;  %v2780_v59 = vpack.c.bf16 (%p717_p10), %v1609_v56, %v1608_v55  ;;  %v1611_v61 = vld [vmem:[#allocation11 + $0x48] sm:$0xff] (%p717_p10)  ;;  %v1446_v62 = vld [vmem:[%s3790_s1 + $0x58] sm:$0xff] (%p717_p10) }
 0x481   : > { %2771 = vmatpush3.bf16.msra.mxu1 %v2768_v44  ;;  %v1610_v60 = vld [vmem:[#allocation11 + $0x40] sm:$0xff]  ;;  %v1612_v1 = vld [vmem:[#allocation11 + $0x50] sm:$0xff]  ;;  %v1613_v18 = vld [vmem:[#allocation11 + $0x58] sm:$0xff] }
 0x482   : > { %2773 = vmatprep.subr.bf16.mxu1 %v2772_v49  ;;  %v2784_v0 = vpack.c.bf16 %v1611_v61, %v1610_v60  ;;  %v1448_v19 = vld [vmem:[%s3790_s1 + $0x68] sm:$0xff]  ;;  %v1447_v20 = vld [vmem:[%s3790_s1 + $0x60] sm:$0xff]  ;;  %v2788_v21 = vpack.c.bf16 %v1613_v18, %v1612_v1  ;;  %v1450_v24 = vld [vmem:[%s3790_s1 + $0x78] sm:$0xff] }
 0x483   : > { %v1614_v22 = vld [vmem:[#allocation11 + $0x60] sm:$0xff]  ;;  %v1615_v23 = vld [vmem:[#allocation11 + $0x68] sm:$0xff]  ;;  %v1616_v27 = vld [vmem:[#allocation11 + $0x70] sm:$0xff] }
 0x484   : > { %1494 = vperm.xlu1 %2992, %v1440_v47   ;;  %1489 = vperm.xlu0 %2991, %v1439_v48   ;;  %v1449_v25 = vld [vmem:[%s3790_s1 + $0x70] sm:$0xff]  ;;  %v2792_v26 = vpack.c.bf16 %v1615_v23, %v1614_v22  ;;  %v1617_v28 = vld [vmem:[#allocation11 + $0x78] sm:$0xff]  ;;  %v1771_v31 = vld [vmem:[%s3798_s9 + $0x8] sm:$0xff] }
 0x485   : > { %2775 = vmatpush3.bf16.msra.mxu1 %v2772_v49  ;;  %v2796_v29 = vpack.c.bf16 %v1617_v28, %v1616_v27  ;;  %v1770_v30 = vld [vmem:[%s3798_s9] sm:$0xff]  ;;  %v1453_v33 = vld [vmem:[#allocation2 + $0x10] sm:$0xff]  ;;  %v1454_v8 = vld [vmem:[#allocation2 + $0x18] sm:$0xff] }
 0x486   : > { %2777 = vmatprep.subr.bf16.mxu1 %v2776_v54  ;;  %v2800_v32 = vpack.c.bf16 %v1771_v31, %v1770_v30  ;;  %v1451_v34 = vld [vmem:[#allocation2] sm:$0xff]  ;;  %v1452_v9 = vld [vmem:[#allocation2 + $0x8] sm:$0xff]  ;;  %v1772_v16 = vld [vmem:[%s3798_s9 + $0x10] sm:$0xff] }
 0x487   : > { %v3678_v2 = vld [vmem:[%s3795_s6] ss:$0 sm:$0xff]  ;;  %v1456_v17 = vld [vmem:[#allocation2 + $0x28] sm:$0xff]  ;;  %v1773_v37 = vld [vmem:[%s3798_s9 + $0x18] sm:$0xff] }
 0x488   : > { %1504 = vperm.xlu1 %2992, %v1442_v52   ;;  %1499 = vperm.xlu0 %2991, %v1441_v53   ;;  %v1455_v36 = vld [vmem:[#allocation2 + $0x20] sm:$0xff]  ;;  %v2804_v45 = vpack.c.bf16 %v1773_v37, %v1772_v16  ;;  %v1775_v47 = vld [vmem:[%s3798_s9 + $0x28] sm:$0xff]  ;;  %v1458_v48 = vld [vmem:[#allocation2 + $0x38] sm:$0xff] }
 0x489   : > { %2779 = vmatpush3.bf16.msra.mxu1 %v2776_v54  ;;  %v1774_v46 = vld [vmem:[%s3798_s9 + $0x20] sm:$0xff]  ;;  %v1457_v49 = vld [vmem:[#allocation2 + $0x30] sm:$0xff]  ;;  %v1777_v60 = vld [vmem:[%s3798_s9 + $0x38] sm:$0xff] }
 0x48a   : > { %2781 = vmatprep.subr.bf16.mxu1 %v2780_v59  ;;  %v2808_v54 = vpack.c.bf16 %v1775_v47, %v1774_v46  ;;  %v1460_v61 = vld [vmem:[#allocation2 + $0x48] sm:$0xff]  ;;  %v1461_v27 = vld [vmem:[#allocation2 + $0x50] sm:$0xff]  ;;  %v1782_v16 = vld [vmem:[%s3798_s9 + $0x60] sm:$0xff] }
 0x48b   : > { %v1783_v37 = vld [vmem:[%s3798_s9 + $0x68] sm:$0xff] }
 0x48c   : > { %1514 = vperm.xlu1 %2992, %v1444_v57   ;;  %1509 = vperm.xlu0 %2991, %v1443_v58  }
 0x48d   : > { %2783 = vmatpush3.bf16.msra.mxu1 %v2780_v59  ;;  %v1776_v59 = vld [vmem:[%s3798_s9 + $0x30] sm:$0xff] }
 0x48e   : > { %2785 = vmatprep.subr.bf16.mxu1 %v2784_v0 }
 0x490   : > { %1524 = vperm.xlu1 %2992, %v1446_v62   ;;  %1519 = vperm.xlu0 %2991, %v1445_v63   ;;  %v1459_v62 = vld [vmem:[#allocation2 + $0x40] sm:$0xff] }
 0x491   : > { %2787 = vmatpush3.bf16.msra.mxu1 %v2784_v0 }
 0x492   : > { %2789 = vmatprep.subr.bf16.mxu1 %v2788_v21 }
 0x494   : > { %1534 = vperm.xlu1 %2992, %v1448_v19   ;;  %1529 = vperm.xlu0 %2991, %v1447_v20   ;;  %v2812_v19 = vpack.c.bf16 %v1777_v60, %v1776_v59 }
 0x495   : > { %2791 = vmatpush3.bf16.msra.mxu1 %v2788_v21 }
 0x496   : > { %2793 = vmatprep.subr.bf16.mxu1 %v2792_v26 }
 0x498   : > { %1544 = vperm.xlu1 %2992, %v1450_v24   ;;  %1539 = vperm.xlu0 %2991, %v1449_v25   ;;  %v1778_v24 = vld [vmem:[%s3798_s9 + $0x40] sm:$0xff]  ;;  %v1779_v25 = vld [vmem:[%s3798_s9 + $0x48] sm:$0xff] }
 0x499   : > { %2795 = vmatpush3.bf16.msra.mxu1 %v2792_v26  ;;  %v1462_v26 = vld [vmem:[#allocation2 + $0x58] sm:$0xff] }
 0x49a   : > { %2797 = vmatprep.subr.bf16.mxu1 %v2796_v29 }
 0x49d   : > { %2799 = vmatpush3.bf16.msra.mxu1 %v2796_v29 }
 0x49e   : > { %2801 = vmatprep.subr.bf16.mxu1 %v2800_v32 }
 0x4fb   : > { %v1480_v3 = vpop.permute.xlu1 %1479  ;;  %v1470_v4 = vpop.permute.xlu0 %1469 }
 0x4fc   : > { %v1549_v6 = vmul.f32 %v1480_v3, %v1453_v33  ;;  %v1547_v7 = vmul.f32 %v1470_v4, %v1451_v34 }
 0x4fe   : > { %v1570_v10 = vadd.f32 %v3678_v2, %v1547_v7  ;;  %v1572_v11 = vadd.f32 %v3678_v2, %v1549_v6  ;;  %v1780_v6 = vld [vmem:[%s3798_s9 + $0x50] sm:$0xff]  ;;  %v1781_v7 = vld [vmem:[%s3798_s9 + $0x58] sm:$0xff] }
 0x4ff   : > { %v1485_v12 = vpop.permute.xlu1 %1484  ;;  %v1475_v13 = vpop.permute.xlu0 %1474 }
 0x500   : > { %v1550_v15 = vmul.f32 %v1485_v12, %v1454_v8  ;;  %v1548_v14 = vmul.f32 %v1475_v13, %v1452_v9  ;;  %v1586_v35 = vmax.f32 %v1570_v10, 0.0  ;;  %v1588_v39 = vmax.f32 %v1572_v11, 0.0  ;;  %v1464_v8 = vld [vmem:[#allocation2 + $0x68] sm:$0xff]  ;;  %v1463_v9 = vld [vmem:[#allocation2 + $0x60] sm:$0xff] }
 0x502   : > { %v1571_v38 = vadd.f32 %v3678_v2, %v1548_v14  ;;  %2589 = vmatprep.mubr.f32.mxu1 %v1586_v35  ;;  %v1573_v40 = vadd.f32 %v3678_v2, %v1550_v15  ;;  %v2820_v15 = vpack.c.bf16 %v1781_v7, %v1780_v6 }
 0x503   : > { %v1495_v5 = vpop.permute.xlu1 %1494  ;;  %v1490_v41 = vpop.permute.xlu0 %1489 }
 0x504   : > { %v1587_v42 = vmax.f32 %v1571_v38, 0.0  ;;  %v1552_v43 = vmul.f32 %v1495_v5, %v1456_v17  ;;  %v1551_v44 = vmul.f32 %v1490_v41, %v1455_v36  ;;  %v1589_v51 = vmax.f32 %v1573_v40, 0.0  ;;  %v1466_v38 = vld [vmem:[#allocation2 + $0x78] sm:$0xff] }
 0x506   : > { %v1574_v50 = vadd.f32 %v3678_v2, %v1551_v44  ;;  %2590 = vmatmul.mubr.f32.vlgmr.msra.gmra.mrb[0].mxu1 %v1587_v42  ;;  %v1575_v55 = vadd.f32 %v3678_v2, %v1552_v43  ;;  %v2824_v43 = vpack.c.bf16 %v1783_v37, %v1782_v16  ;;  %v1938_v16 = vld [vmem:[%s3799_s10] sm:$0x1] }
 0x507   : > { %v1505_v52 = vpop.permute.xlu1 %1504  ;;  %2592 = vmatprep.mubr.f32.mxu1 %v1588_v39  ;;  %v1500_v53 = vpop.permute.xlu0 %1499  ;;  %2803 = vmatpush3.bf16.msra.mxu1 %v2800_v32  ;;  %v2816_v32 = vpack.c.bf16 %v1779_v25, %v1778_v24  ;;  %v1465_v39 = vld [vmem:[#allocation2 + $0x70] sm:$0xff]  ;;  %v2245_v37 = vld [vmem:[#allocation5] ss:$0 sm:$0xff] }
 0x508   : > { %v1590_v56 = vmax.f32 %v1574_v50, 0.0  ;;  %v1554_v57 = vmul.f32 %v1505_v52, %v1458_v48  ;;  %v1553_v58 = vmul.f32 %v1500_v53, %v1457_v49  ;;  %2805 = vmatprep.subr.bf16.mxu1 %v2804_v45  ;;  %v1591_v20 = vmax.f32 %v1575_v55, 0.0  ;;  %v1784_v53 = vld [vmem:[%s3798_s9 + $0x70] sm:$0xff] }
 0x50a   : > { %v1576_v63 = vadd.f32 %v3678_v2, %v1553_v58  ;;  %2593 = vmatmul.mubr.f32.gmra.mrb[2].mxu1 %v1589_v51  ;;  %v1577_v0 = vadd.f32 %v3678_v2, %v1554_v57  ;;  %v2244_v57 = vld [vmem:[%s3797_s8] ss:$0 sm:$0xff] }
 0x50b   : > { %v1515_v1 = vpop.permute.xlu1 %1514  ;;  %2595 = vmatprep.mubr.f32.mxu1 %v1590_v56  ;;  %v1510_v18 = vpop.permute.xlu0 %1509  ;;  %2807 = vmatpush3.bf16.msra.mxu1 %v2804_v45  ;;  %v3150_v56 = vmov 0.0|0.0  }
 0x50c   : > { %v1592_v21 = vmax.f32 %v1576_v63, 0.0  ;;  %v1556_v22 = vmul.f32 %v1515_v1, %v1460_v61  ;;  %v1555_v23 = vmul.f32 %v1510_v18, %v1459_v62  ;;  %2809 = vmatprep.subr.bf16.mxu1 %v2808_v54  ;;  %v1593_v29 = vmax.f32 %v1577_v0, 0.0  ;;  %2832 = vmatprep.subr.bf16.mxu0 %v3150_v56 }
 0x50e   : > { %v1578_v28 = vadd.f32 %v3678_v2, %v1555_v23  ;;  %2596 = vmatmul.mubr.f32.gmra.mrb[4].mxu1 %v1591_v20  ;;  %v1579_v33 = vadd.f32 %v3678_v2, %v1556_v22 }
 0x50f   : > { %v1525_v30 = vpop.permute.xlu1 %1524  ;;  %2598 = vmatprep.mubr.f32.mxu1 %v1592_v21  ;;  %v1520_v31 = vpop.permute.xlu0 %1519  ;;  %2811 = vmatpush3.bf16.msra.mxu1 %v2808_v54  ;;  %v1785_v54 = vld [vmem:[%s3798_s9 + $0x78] sm:$0xff] }
 0x510   : > { %v1594_v34 = vmax.f32 %v1578_v28, 0.0  ;;  %v1558_v3 = vmul.f32 %v1525_v30, %v1462_v26  ;;  %v1557_v4 = vmul.f32 %v1520_v31, %v1461_v27  ;;  %2813 = vmatprep.subr.bf16.mxu1 %v2812_v19  ;;  %v1595_v14 = vmax.f32 %v1579_v33, 0.0 }
 0x511   : > { %v2828_v55 = vpack.c.bf16 %v1785_v54, %v1784_v53 }
 0x512   : > { %v1580_v10 = vadd.f32 %v3678_v2, %v1557_v4  ;;  %2599 = vmatmul.mubr.f32.gmra.mrb[6].mxu1 %v1593_v29  ;;  %v1581_v11 = vadd.f32 %v3678_v2, %v1558_v3 }
 0x513   : > { %v1535_v12 = vpop.permute.xlu1 %1534  ;;  %2601 = vmatprep.mubr.f32.mxu1 %v1594_v34  ;;  %v1530_v13 = vpop.permute.xlu0 %1529  ;;  %2815 = vmatpush3.bf16.msra.mxu1 %v2812_v19 }
 0x514   : > { %v1596_v35 = vmax.f32 %v1580_v10, 0.0  ;;  %v1560_v17 = vmul.f32 %v1535_v12, %v1464_v8  ;;  %v1559_v36 = vmul.f32 %v1530_v13, %v1463_v9  ;;  %2817 = vmatprep.subr.bf16.mxu1 %v2816_v32  ;;  %v1597_v5 = vmax.f32 %v1581_v11, 0.0 }
 0x516   : > { %v1582_v40 = vadd.f32 %v3678_v2, %v1559_v36  ;;  %2602 = vmatmul.mubr.f32.gmra.mrb[8].mxu1 %v1595_v14  ;;  %v1583_v44 = vadd.f32 %v3678_v2, %v1560_v17 }
 0x517   : > { %v1545_v41 = vpop.permute.xlu1 %1544  ;;  %2604 = vmatprep.mubr.f32.mxu1 %v1596_v35  ;;  %v1540_v42 = vpop.permute.xlu0 %1539  ;;  %2819 = vmatpush3.bf16.msra.mxu1 %v2816_v32 }
 0x518   : > { %v1598_v45 = vmax.f32 %v1582_v40, 0.0  ;;  %v1562_v46 = vmul.f32 %v1545_v41, %v1466_v38  ;;  %v1561_v47 = vmul.f32 %v1540_v42, %v1465_v39  ;;  %2821 = vmatprep.subr.bf16.mxu1 %v2820_v15  ;;  %v1599_v49 = vmax.f32 %v1583_v44, 0.0 }
 0x51a   : > { %v1584_v48 = vadd.f32 %v3678_v2, %v1561_v47  ;;  %2605 = vmatmul.mubr.f32.gmra.mrb[10].mxu1 %v1597_v5  ;;  %v1585_v50 = vadd.f32 %v3678_v2, %v1562_v46  ;;  %v3152_v2 = vmov 0.0  }
 0x51b   : > { %2607 = vmatprep.mubr.f32.mxu1 %v1598_v45  ;;  %2823 = vmatpush3.bf16.msra.mxu1 %v2820_v15 }
 0x51c   : > { %v1600_v51 = vmax.f32 %v1584_v48, 0.0  ;;  %2825 = vmatprep.subr.bf16.mxu1 %v2824_v43  ;;  %v1601_v52 = vmax.f32 %v1585_v50, 0.0  ;;  %2701 = vmatprep.mubr.msk.f32.mxu0 %vm3151_vm0, %v3152_v2 }
 0x51e   : > { %2608 = vmatmul.mubr.f32.gmra.mrb[12].mxu1 %v1599_v49 }
 0x51f   : > { %2610 = vmatprep.mubr.f32.mxu1 %v1600_v51  ;;  %2827 = vmatpush3.bf16.msra.mxu1 %v2824_v43 }
 0x520   : > { %2829 = vmatprep.subr.bf16.mxu1 %v2828_v55 }
 0x522   : > { %2611 = vmatmul.mubr.f32.gmra.mrb[14].mxu1 %v1601_v52 }
 0x523   : > { %2831 = vmatpush3.bf16.msra.mxu1 %v2828_v55 }
 0x5d9   : > { %v2591_v58 = vpop.f32.mrb[0].mxu1 }
 0x5da   : > { %v1697_v59 = vadd.f32 %v2591_v58, %v2244_v57  ;;  %v1691_v60 = vpop.f32.mrb[1].mxu1 }
 0x5db   : > { %v1692_v61 = vadd.f32 %v2244_v57, %v1691_v60 }
 0x5dd   : > { %v2594_v62 = vpop.f32.mrb[2].mxu1  ;;  %2645 = vmatprep.mubr.f32.mxu1 %v1692_v61  ;;  %v2833_v63 = vpack.c.bf16 %v1697_v59, %v1692_v61 }
 0x5de   : > { %v1707_v0 = vadd.f32 %v2594_v62, %v2244_v57  ;;  %v1701_v1 = vpop.f32.mrb[3].mxu1  ;;  %2646 = vmatmul.mubr.f32.vlgmr.msra.gmra.mrb[16].mxu1 %v1697_v59 }
 0x5df   : > { %v1702_v18 = vadd.f32 %v2244_v57, %v1701_v1  ;;  %2834 = vmatpush3.bf16.xpose.msra.mxu0 %v2833_v63 }
 0x5e0   : > { %2835 = vmatprep.subr.bf16.mxu0 %v3150_v56 }
 0x5e1   : > { %v2836_v19 = vpack.c.bf16 %v1707_v0, %v1702_v18  ;;  %v2597_v20 = vpop.f32.mrb[4].mxu1  ;;  %2648 = vmatprep.mubr.f32.mxu1 %v1702_v18 }
 0x5e2   : > { %v1717_v21 = vadd.f32 %v2597_v20, %v2244_v57  ;;  %v1711_v22 = vpop.f32.mrb[5].mxu1  ;;  %2649 = vmatmul.mubr.f32.gmra.mrb[18].mxu1 %v1707_v0 }
 0x5e3   : > { %v1712_v23 = vadd.f32 %v2244_v57, %v1711_v22  ;;  %v2089_v22 = vlaneseq }
 0x5e5   : > { %v2839_v24 = vpack.c.bf16 %v1717_v21, %v1712_v23  ;;  %v2600_v25 = vpop.f32.mrb[6].mxu1  ;;  %2651 = vmatprep.mubr.f32.mxu1 %v1712_v23  ;;  %v2090_v23 = vshrl.u32 %v2089_v22, 7 }
 0x5e6   : > { %v1727_v26 = vadd.f32 %v2600_v25, %v2244_v57  ;;  %v1721_v27 = vpop.f32.mrb[7].mxu1  ;;  %2652 = vmatmul.mubr.f32.gmra.mrb[20].mxu1 %v1717_v21 }
 0x5e7   : > { %v1722_v28 = vadd.f32 %v2244_v57, %v1721_v27  ;;  %2837 = vmatpush3.bf16.xpose.msra.mxu0 %v2836_v19 }
 0x5e8   : > { %2838 = vmatprep.subr.bf16.mxu0 %v3150_v56 }
 0x5e9   : > { %v2842_v29 = vpack.c.bf16 %v1727_v26, %v1722_v28  ;;  %v2603_v30 = vpop.f32.mrb[8].mxu1  ;;  %2654 = vmatprep.mubr.f32.mxu1 %v1722_v28 }
 0x5ea   : > { %v1737_v31 = vadd.f32 %v2603_v30, %v2244_v57  ;;  %v1731_v32 = vpop.f32.mrb[9].mxu1  ;;  %2655 = vmatmul.mubr.f32.gmra.mrb[22].mxu1 %v1727_v26 }
 0x5eb   : > { %v1732_v33 = vadd.f32 %v2244_v57, %v1731_v32 }
 0x5ed   : > { %v2845_v34 = vpack.c.bf16 %v1737_v31, %v1732_v33  ;;  %v2606_v3 = vpop.f32.mrb[10].mxu1  ;;  %2657 = vmatprep.mubr.f32.mxu1 %v1732_v33 }
 0x5ee   : > { %v1747_v4 = vadd.f32 %v2606_v3, %v2244_v57  ;;  %v1741_v6 = vpop.f32.mrb[11].mxu1  ;;  %2658 = vmatmul.mubr.f32.gmra.mrb[24].mxu1 %v1737_v31 }
 0x5ef   : > { %v1742_v7 = vadd.f32 %v2244_v57, %v1741_v6  ;;  %2840 = vmatpush3.bf16.xpose.msra.mxu0 %v2839_v24  ;;  %v2091_v24 = vsub.s32 0, %v2090_v23 }
 0x5f0   : > { %2841 = vmatprep.subr.bf16.mxu0 %v3150_v56 }
 0x5f1   : > { %v2848_v8 = vpack.c.bf16 %v1747_v4, %v1742_v7  ;;  %v2609_v9 = vpop.f32.mrb[12].mxu1  ;;  %2660 = vmatprep.mubr.f32.mxu1 %v1742_v7 }
 0x5f2   : > { %v1757_v10 = vadd.f32 %v2609_v9, %v2244_v57  ;;  %v1751_v11 = vpop.f32.mrb[13].mxu1  ;;  %2661 = vmatmul.mubr.f32.gmra.mrb[26].mxu1 %v1747_v4 }
 0x5f3   : > { %v1752_v12 = vadd.f32 %v2244_v57, %v1751_v11 }
 0x5f5   : > { %v2851_v13 = vpack.c.bf16 %v1757_v10, %v1752_v12  ;;  %v2612_v15 = vpop.f32.mrb[14].mxu1  ;;  %2663 = vmatprep.mubr.f32.mxu1 %v1752_v12 }
 0x5f6   : > { %v1767_v14 = vadd.f32 %v2612_v15, %v2244_v57  ;;  %v1761_v35 = vpop.f32.mrb[15].mxu1  ;;  %2664 = vmatmul.mubr.f32.gmra.mrb[28].mxu1 %v1757_v10 }
 0x5f7   : > { %v1762_v17 = vadd.f32 %v2244_v57, %v1761_v35  ;;  %2843 = vmatpush3.bf16.xpose.msra.mxu0 %v2842_v29 }
 0x5f8   : > { %2844 = vmatprep.subr.bf16.mxu0 %v3150_v56 }
 0x5f9   : > { %v2854_v36 = vpack.c.bf16 %v1767_v14, %v1762_v17  ;;  %2666 = vmatprep.mubr.f32.mxu1 %v1762_v17 }
 0x5fa   : > { %2667 = vmatmul.mubr.f32.gmra.mrb[30].mxu1 %v1767_v14 }
 0x5ff   : > { %2846 = vmatpush3.bf16.xpose.msra.mxu0 %v2845_v34 }
 0x600   : > { %2847 = vmatprep.subr.bf16.mxu0 %v3150_v56 }
 0x607   : > { %2849 = vmatpush3.bf16.xpose.msra.mxu0 %v2848_v8 }
 0x608   : > { %2850 = vmatprep.subr.bf16.mxu0 %v3150_v56 }
 0x60f   : > { %2852 = vmatpush3.bf16.xpose.msra.mxu0 %v2851_v13 }
 0x610   : > { %2853 = vmatprep.subr.bf16.mxu0 %v3150_v56 }
 0x617   : > { %2855 = vmatpush3.bf16.xpose.msra.mxu0 %v2854_v36 }
 0x61e   : > { %2702 = vmatmul.mubr.f32.vlgmr.msra.gmra.mrb[0].mxu0 %v1938_v16 }
 0x6b1   : > { %v2647_v38 = vpop.f32.mrb[16].mxu1 }
 0x6b2   : > { %v1865_v39 = vadd.f32 %v2647_v38, %v2245_v37  ;;  %v1859_v40 = vpop.f32.mrb[17].mxu1 }
 0x6b3   : > { %v1860_v5 = vadd.f32 %v2245_v37, %v1859_v40 }
 0x6b4   : > { %2016 = vperm.xlu1 %2992, %v1865_v39  }
 0x6b5   : > { %v2650_v41 = vpop.f32.mrb[18].mxu1  ;;  %2011 = vperm.xlu0 %2991, %v1860_v5  }
 0x6b6   : > { %v1875_v42 = vadd.f32 %v2650_v41, %v2245_v37  ;;  %v1869_v43 = vpop.f32.mrb[19].mxu1 }
 0x6b7   : > { %v1870_v44 = vadd.f32 %v2245_v37, %v1869_v43 }
 0x6b8   : > { %2026 = vperm.xlu1 %2992, %v1875_v42  }
 0x6b9   : > { %v2653_v45 = vpop.f32.mrb[20].mxu1  ;;  %2021 = vperm.xlu0 %2991, %v1870_v44  }
 0x6ba   : > { %v1885_v46 = vadd.f32 %v2653_v45, %v2245_v37  ;;  %v1879_v47 = vpop.f32.mrb[21].mxu1 }
 0x6bb   : > { %v1880_v48 = vadd.f32 %v2245_v37, %v1879_v47 }
 0x6bc   : > { %2036 = vperm.xlu1 %2992, %v1885_v46  }
 0x6bd   : > { %v2656_v49 = vpop.f32.mrb[22].mxu1  ;;  %2031 = vperm.xlu0 %2991, %v1880_v48  }
 0x6be   : > { %v1895_v50 = vadd.f32 %v2656_v49, %v2245_v37  ;;  %v1889_v51 = vpop.f32.mrb[23].mxu1 }
 0x6bf   : > { %v1890_v52 = vadd.f32 %v2245_v37, %v1889_v51 }
 0x6c0   : > { %2046 = vperm.xlu1 %2992, %v1895_v50  }
 0x6c1   : > { %v2659_v53 = vpop.f32.mrb[24].mxu1  ;;  %2041 = vperm.xlu0 %2991, %v1890_v52  }
 0x6c2   : > { %v1905_v54 = vadd.f32 %v2659_v53, %v2245_v37  ;;  %v1899_v55 = vpop.f32.mrb[25].mxu1 }
 0x6c3   : > { %v1900_v56 = vadd.f32 %v2245_v37, %v1899_v55 }
 0x6c4   : > { %2056 = vperm.xlu1 %2992, %v1905_v54  }
 0x6c5   : > { %v2662_v2 = vpop.f32.mrb[26].mxu1  ;;  %2051 = vperm.xlu0 %2991, %v1900_v56  }
 0x6c6   : > { %v1915_v57 = vadd.f32 %v2662_v2, %v2245_v37  ;;  %v1909_v58 = vpop.f32.mrb[27].mxu1 }
 0x6c7   : > { %v1910_v59 = vadd.f32 %v2245_v37, %v1909_v58 }
 0x6c8   : > { %2066 = vperm.xlu1 %2992, %v1915_v57  }
 0x6c9   : > { %v2665_v60 = vpop.f32.mrb[28].mxu1  ;;  %2061 = vperm.xlu0 %2991, %v1910_v59  }
 0x6ca   : > { %v1925_v61 = vadd.f32 %v2665_v60, %v2245_v37  ;;  %v1919_v62 = vpop.f32.mrb[29].mxu1 }
 0x6cb   : > { %v1920_v63 = vadd.f32 %v2245_v37, %v1919_v62 }
 0x6cc   : > { %2076 = vperm.xlu1 %2992, %v1925_v61  }
 0x6cd   : > { %2071 = vperm.xlu0 %2991, %v1920_v63   ;;  %v2668_v0 = vpop.f32.mrb[30].mxu1 }
 0x6ce   : > { %v1935_v1 = vadd.f32 %v2668_v0, %v2245_v37  ;;  %v1929_v18 = vpop.f32.mrb[31].mxu1 }
 0x6cf   : > { %v1930_v19 = vadd.f32 %v2245_v37, %v1929_v18 }
 0x6d0   : > { %2086 = vperm.xlu1 %2992, %v1935_v1  }
 0x6d1   : > { %2081 = vperm.xlu0 %2991, %v1930_v19  }
 0x6f1   : > { %v2005_v20 = vpop.f32.mrb[0].mxu0 }
 0x6f2   : > { %v2703_v21 = vpop.f32.mrb[1].mxu0  ;;  %v2092_v25 = vrot.slane %v2005_v20, %v2091_v24 }
 0x733   : > { %v2017_v26 = vpop.permute.xlu1 %2016 }
 0x734   : > { %v2094_v27 = vadd.f32 %v2092_v25, %v2017_v26  ;;  %v2012_v28 = vpop.permute.xlu0 %2011 }
 0x735   : > { %v2093_v29 = vadd.f32 %v2092_v25, %v2012_v28 }
 0x736   : > { %2110 = vst [vmem:[#allocation12 + $0x8] sm:$0xff] %v2094_v27 }
 0x737   : > { %2109 = vst [vmem:[#allocation12] sm:$0xff] %v2093_v29  ;;  %v2027_v30 = vpop.permute.xlu1 %2026 }
 0x738   : > { %v2096_v31 = vadd.f32 %v2092_v25, %v2027_v30  ;;  %v2022_v32 = vpop.permute.xlu0 %2021 }
 0x739   : > { %v2095_v33 = vadd.f32 %v2092_v25, %v2022_v32 }
 0x73a   : > { %2112 = vst [vmem:[#allocation12 + $0x18] sm:$0xff] %v2096_v31 }
 0x73b   : > { %2111 = vst [vmem:[#allocation12 + $0x10] sm:$0xff] %v2095_v33  ;;  %v2037_v34 = vpop.permute.xlu1 %2036 }
 0x73c   : > { %v2098_v3 = vadd.f32 %v2092_v25, %v2037_v34  ;;  %v2032_v4 = vpop.permute.xlu0 %2031 }
 0x73d   : > { %v2097_v6 = vadd.f32 %v2092_v25, %v2032_v4 }
 0x73e   : > { %2114 = vst [vmem:[#allocation12 + $0x28] sm:$0xff] %v2098_v3 }
 0x73f   : > { %2113 = vst [vmem:[#allocation12 + $0x20] sm:$0xff] %v2097_v6  ;;  %v2047_v7 = vpop.permute.xlu1 %2046 }
 0x740   : > { %v2100_v8 = vadd.f32 %v2092_v25, %v2047_v7  ;;  %v2042_v9 = vpop.permute.xlu0 %2041 }
 0x741   : > { %v2099_v10 = vadd.f32 %v2092_v25, %v2042_v9 }
 0x742   : > { %2116 = vst [vmem:[#allocation12 + $0x38] sm:$0xff] %v2100_v8 }
 0x743   : > { %2115 = vst [vmem:[#allocation12 + $0x30] sm:$0xff] %v2099_v10  ;;  %v2057_v11 = vpop.permute.xlu1 %2056 }
 0x744   : > { %v2102_v12 = vadd.f32 %v2092_v25, %v2057_v11  ;;  %v2052_v13 = vpop.permute.xlu0 %2051 }
 0x745   : > { %v2101_v15 = vadd.f32 %v2092_v25, %v2052_v13 }
 0x746   : > { %2118 = vst [vmem:[#allocation12 + $0x48] sm:$0xff] %v2102_v12 }
 0x747   : > { %2117 = vst [vmem:[#allocation12 + $0x40] sm:$0xff] %v2101_v15  ;;  %v2067_v14 = vpop.permute.xlu1 %2066 }
 0x748   : > { %v2104_v35 = vadd.f32 %v2092_v25, %v2067_v14  ;;  %v2062_v17 = vpop.permute.xlu0 %2061 }
 0x749   : > { %v2103_v36 = vadd.f32 %v2092_v25, %v2062_v17 }
 0x74a   : > { %2120 = vst [vmem:[#allocation12 + $0x58] sm:$0xff] %v2104_v35 }
 0x74b   : > { %2119 = vst [vmem:[#allocation12 + $0x50] sm:$0xff] %v2103_v36  ;;  %v2077_v16 = vpop.permute.xlu1 %2076 }
 0x74c   : > { %v2106_v37 = vadd.f32 %v2092_v25, %v2077_v16  ;;  %v2072_v38 = vpop.permute.xlu0 %2071 }
 0x74d   : > { %v2105_v39 = vadd.f32 %v2092_v25, %v2072_v38 }
 0x74e   : > { %2122 = vst [vmem:[#allocation12 + $0x68] sm:$0xff] %v2106_v37 }
 0x74f   : > { %2121 = vst [vmem:[#allocation12 + $0x60] sm:$0xff] %v2105_v39  ;;  %v2087_v40 = vpop.permute.xlu1 %2086 }
 0x750   : > { %v2108_v5 = vadd.f32 %v2092_v25, %v2087_v40  ;;  %v2082_v41 = vpop.permute.xlu0 %2081 }
 0x751   : > { %v2107_v42 = vadd.f32 %v2092_v25, %v2082_v41 }
 0x752   : > { %2124 = vst [vmem:[#allocation12 + $0x78] sm:$0xff] %v2108_v5 }
 0x753   : > { %2123 = vst [vmem:[#allocation12 + $0x70] sm:$0xff] %v2107_v42 }
 0x754 PF: > { %s3823_s17 = sld [smem:[#allocation17_spill]]  ;;  %s3153_s29 = smov [#allocation12]  }
 0x755   : > { %s2131_s30 = sshll.u32 %s3153_s29, 4  ;;  %s2132_s30 = int_to_ptr.vmem [resolvable:$true] %s2131_s30 }
 0x756   : > { %s3077_s22 = scalar_lea.vmem %s2132_s30, 2048  ;;  %p3084_p1 = scmp.lt.s32.totalorder %s2132_s30, %s2132_s30 }
 0x757   : > { %p3078_p13 = scmp.ne.s32.totalorder %s2132_s30, %s3077_s22  ;;  %p3085_p4 = scmp.lt.s32.totalorder %s3077_s22, %s3077_s22 }
 0x759   : > { %p3086_p7 = por %p3085_p4, %p3084_p1 }
 0x75a   : > { %s3824_s27 = sadd.s32 4294967295, %s3823_s17  }
 0x75b   : > { %p3754_p12 = scmp.eq.s32.totalorder %s3824_s27, 1 }
 0x75d   : > { %p3079_p6 = pnand %p3078_p13, %p3754_p12 }
 0x75f   : > { %p3080_p0 = pneg %p3079_p6 }
 0x761   : > { %p3087_p9 = pnand %p3086_p7, %p3080_p0 }
 0x763   : > { %3090 = shalt.err (!%p3087_p9)
}
 0x764   : > { %s3826_s18 = sld [smem:[#allocation18_spill]] }
 0x76a   : > { %s3091_s19 = scalar_lea.hbm %s3826_s18, 2048 }
 0x76b   : > { %p3092_p3 = scmp.ne.s32.totalorder %s3826_s18, %s3091_s19  ;;  %p3097_p5 = scmp.lt.u32.totalorder %s3091_s19, %s3826_s18 }
 0x76d   : > { %p3093_p8 = pnand %p3092_p3, %p3754_p12 }
 0x76f   : > { %p3094_p2 = pneg %p3093_p8 }
 0x771   : > { %p3099_p10 = pnand %p3097_p5, %p3094_p2 }
 0x773   : > { %3102 = shalt.err (!%p3099_p10)
}
 0x774   : > { %s3154_s15 = smov 128   ;;  %s3155_s26 = smov 8  }
 0x775   : > { %2917 = dma.vmem_to_hbm [thread:$0]  (%p3754_p12), %s2132_s30, 2048, %s3826_s18, [#allocation8], %s3154_s15, %s3154_s15, %s3155_s26  }
 0x776   : > { %3124 = dma.done.wait (%p3754_p12), [#allocation8], 2048  }
 0x777   : > { %3126 = vsyncadd (%p3754_p12), [#allocation8], 4294965248 }
 0x778 PF: > { %s3827_s14 = sld [smem:[#allocation17_spill]]  ;;  %s3828_s23 = sld [smem:[#allocation16_spill]] }
 0x779   : > { %s3829_s24 = smov %s3831_s13 }
 0x77e   : > { %s27_s25 = sadd.s32 1, %s3827_s14  }
 0x77f   : > { %p24_p11 = scmp.ge.s32.totalorder %s27_s25, 4  }
 0x781   :  { %26 = sbr.rel (!%p24_p11) target bundleno = 7 (0x7), region = 131 }
 0x788   :  { %2147 = vsyncpa [#allocation7], 1 }
 0x789   :  { %2149 = vsyncpa [#allocation7 + $0x1], 1 }
 0x78a   :  { %2150 = vsyncpa [#allocation10], 1 }
 0x78b   :  { %2151 = vsyncpa [#allocation8], 1 }
 0x78c   :  { %2153 = vsyncpa [#allocation8 + $0x1], 1 }

</bundles_post_ra>
